<compile_context>
chip_gen: v7x
topology: tpu7x:2x2x1
jax: 0.10.0
libtpu: 0.0.40
codegen_flags: <defaults>
</compile_context>

<pallas_src>
import functools

import jax
import jax.numpy as jnp
from jax import lax
from jax.experimental import pallas as pl
from jax.experimental.pallas import tpu as pltpu

_SQRT2 = 1.4142135623730951


def _gelu_exact(x):
    # PyTorch nn.GELU() default ('none' approximation) == exact erf GELU.
    return 0.5 * x * (1.0 + lax.erf(x / _SQRT2))


def _conv_att_kernel(x_ref, w1_ref, b1_ref, w2_ref, b2_ref, masks_ref, ws_ref,
                     out_ref, f_ref, pooled_ref, *, W, L):
    Nb, C, HW = x_ref.shape                      # HW == H * W (lane-dense)
    OFF = 3 * W + 3                              # leading zeros of the flat maps

    x = x_ref[...].astype(jnp.float32)           # (Nb, C, HW)

    # ---------------- Channel attention ----------------
    # Pooled stats of the whole image block as one (C, 2*Nb) RHS:
    # columns [max_0 .. max_{Nb-1}, mean_0 .. mean_{Nb-1}].
    for n in range(Nb):
        xn = x[n]                                                       # (C, HW)
        pooled_ref[:, n:n + 1] = jnp.max(xn, axis=1, keepdims=True)
        pooled_ref[:, Nb + n:Nb + n + 1] = jnp.mean(xn, axis=1, keepdims=True)
    pooled = pooled_ref[...]                                            # (C, 2*Nb)

    # Single fused shared-MLP pass for max & mean of every image.
    h = jnp.dot(w1_ref[...], pooled, preferred_element_type=jnp.float32) + b1_ref[...]
    h = _gelu_exact(h)
    o = jnp.dot(w2_ref[...], h, preferred_element_type=jnp.float32) + b2_ref[...]
    ch = jax.nn.sigmoid(o[:, :Nb] + o[:, Nb:])                          # (C, Nb)

    # ---------------- Spatial attention ----------------
    # Flat zero-padded pooled maps: f_ref[c, n, OFF + r*W + col] = map[r, col].
    # Borders stay zero; the interior is rewritten every grid step.
    f_ref[...] = jnp.zeros(f_ref.shape, f_ref.dtype)

    x_ca = []
    for n in range(Nb):
        xc = x[n] * ch[:, n:n + 1]               # (C, HW): lane-broadcast channel gate
        x_ca.append(xc)
        f_ref[0, n:n + 1, OFF:OFF + HW] = jnp.max(xc, axis=0, keepdims=True)
        f_ref[1, n:n + 1, OFF:OFF + HW] = (
            jnp.sum(xc, axis=0, keepdims=True) * (1.0 / C))

    maps = (f_ref[0], f_ref[1])                  # two (Nb, L) loads total
    masks = masks_ref[...]                       # (7, HW) column-validity masks

    # 98-tap 7x7 'same' conv: every tap is a static lane-shifted slice of the
    # flat maps (row padding comes from the zero borders, column padding from
    # the per-dw masks); the whole image block is accumulated at once.
    acc = jnp.zeros((Nb, HW), jnp.float32)
    for dw in range(7):
        part = jnp.zeros((Nb, HW), jnp.float32)
        for c in range(2):
            mc = maps[c]
            for dh in range(7):
                wgt = ws_ref[c * 49 + dh * 7 + dw]          # scalar from SMEM
                a = dh * W + dw
                part = part + wgt * mc[:, a:a + HW]
        acc = acc + masks[dw:dw + 1, :] * part
    sp = jax.nn.sigmoid(acc)                                 # (Nb, HW) spatial gate

    # spatial gate * channel-gated x, plus the outer residual (lane-dense store).
    for n in range(Nb):
        out_ref[n] = (x_ca[n] * sp[n:n + 1, :] + x[n]).astype(out_ref.dtype)


def convolutional_attention(x, w1, b1, w2, b2, ws, *, block_n=None):
    """x: (N, C, H, W); w1 (hidden, C); b1 (hidden, 1); w2 (C, hidden);
    b2 (C, 1); ws (2*7*7,)  ->  (N, C, H, W)."""
    N, C, H, W = x.shape
    hidden = w1.shape[0]
    HW = H * W

    if block_n is None:
        block_n = 1
        for cand in (8, 4, 2, 1):
            if N % cand == 0:
                block_n = cand
                break
    assert N % block_n == 0

    # Flat padded lane length: 3*W+3 leading zeros + H*W data + >=3*W+3
    # trailing zeros, rounded up to a multiple of 128 lanes.
    L = ((HW + 6 * W + 6 + 127) // 128) * 128

    # Column-validity masks for the 7 horizontal tap offsets (dw - 3).
    col = jnp.arange(HW, dtype=jnp.int32) % W
    masks = jnp.stack(
        [((col + (dw - 3) >= 0) & (col + (dw - 3) < W)).astype(jnp.float32)
         for dw in range(7)], axis=0)                                   # (7, HW)

    x2 = x.reshape(N, C, HW)                                            # lane-dense view

    kernel = functools.partial(_conv_att_kernel, W=W, L=L)
    out2 = pl.pallas_call(
        kernel,
        out_shape=jax.ShapeDtypeStruct((N, C, HW), x.dtype),
        grid=(N // block_n,),
        in_specs=[
            pl.BlockSpec((block_n, C, HW), lambda i: (i, 0, 0)),
            pl.BlockSpec((hidden, C), lambda i: (0, 0)),
            pl.BlockSpec((hidden, 1), lambda i: (0, 0)),
            pl.BlockSpec((C, hidden), lambda i: (0, 0)),
            pl.BlockSpec((C, 1), lambda i: (0, 0)),
            pl.BlockSpec((7, HW), lambda i: (0, 0)),
            pl.BlockSpec(memory_space=pltpu.MemorySpace.SMEM),
        ],
        out_specs=pl.BlockSpec((block_n, C, HW), lambda i: (i, 0, 0)),
        scratch_shapes=[
            pltpu.VMEM((2, block_n, L), jnp.float32),     # flat padded maps
            pltpu.VMEM((C, 2 * block_n), jnp.float32),    # pooled-stats RHS
        ],
        compiler_params=pltpu.CompilerParams(
            dimension_semantics=("parallel",),            # batch axis is independent
            vmem_limit_bytes=32 * 1024 * 1024,
        ),
    )(x2, w1, b1, w2, b2, masks, ws)
    return out2.reshape(N, C, H, W)


def _reference(x, w1, b1, w2, b2, ws):
    """Pure-JAX reference matching the PyTorch forward."""
    p_max = jnp.max(x, axis=(2, 3))            # (N, C)
    p_mean = jnp.mean(x, axis=(2, 3))

    def mlp(v):
        h = v @ w1.T + b1[:, 0]
        h = 0.5 * h * (1.0 + lax.erf(h / _SQRT2))
        return h @ w2.T + b2[:, 0]

    ch = jax.nn.sigmoid(mlp(p_max) + mlp(p_mean))[:, :, None, None]
    x_ca = x * ch
    s_max = jnp.max(x_ca, axis=1, keepdims=True)
    s_mean = jnp.mean(x_ca, axis=1, keepdims=True)
    s_cat = jnp.concatenate([s_max, s_mean], axis=1)       # (N, 2, H, W)
    wc = ws.reshape(1, 2, 7, 7)
    sp = lax.conv_general_dilated(
        s_cat, wc, (1, 1), 'SAME',
        dimension_numbers=('NCHW', 'OIHW', 'NCHW'),
        precision=lax.Precision.HIGHEST)
    sp = jax.nn.sigmoid(sp)
    return x_ca * sp + x


if __name__ == "__main__":
    N, C, H, W = 2, 8, 16, 16
    ratio = 2
    hidden = C // ratio

    key = jax.random.PRNGKey(0)
    kx, k1, k2, k3, k4, k5 = jax.random.split(key, 6)
    x = jax.random.normal(kx, (N, C, H, W), jnp.float32)
    # Deterministic synthetic parameters (shapes from the module's __init__).
    w1 = 0.3 * jax.random.normal(k1, (hidden, C), jnp.float32)   # conv1 1x1
    b1 = 0.1 * jax.random.normal(k2, (hidden, 1), jnp.float32)
    w2 = 0.3 * jax.random.normal(k3, (C, hidden), jnp.float32)   # conv2 1x1
    b2 = 0.1 * jax.random.normal(k4, (C, 1), jnp.float32)
    ws = 0.1 * jax.random.normal(k5, (2 * 7 * 7,), jnp.float32)  # 7x7, no bias

    out = convolutional_attention(x, w1, b1, w2, b2, ws)
    out = jax.block_until_ready(out)

    ref = _reference(x, w1, b1, w2, b2, ws)
    assert out.shape == (N, C, H, W)
    max_err = float(jnp.max(jnp.abs(out - ref)))
    assert jnp.allclose(out, ref, atol=1e-3, rtol=1e-3), max_err
    print("KERNEL_OK")
</pallas_src>

<mosaic_0001>
module attributes {stable_mosaic.version = 11 : i64} {
  func.func @_conv_att_kernel(%arg0: i32, %arg1: memref<2x8x256xf32, #tpu.memory_space<vmem>>, %arg2: memref<4x8xf32, #tpu.memory_space<vmem>>, %arg3: memref<4x1xf32, #tpu.memory_space<vmem>>, %arg4: memref<8x4xf32, #tpu.memory_space<vmem>>, %arg5: memref<8x1xf32, #tpu.memory_space<vmem>>, %arg6: memref<7x256xf32, #tpu.memory_space<vmem>>, %arg7: memref<98xf32, #tpu.memory_space<smem>>, %arg8: memref<2x8x256xf32, #tpu.memory_space<vmem>>, %arg9: memref<2x2x384xf32, #tpu.memory_space<vmem>>, %arg10: memref<8x4xf32, #tpu.memory_space<vmem>>) attributes {dimension_semantics = [#tpu.dimension_semantics<parallel>], iteration_bounds = array<i64: 1>, scalar_prefetch = 0 : i64, scratch_operands = 2 : i64, tpu.core_type = #tpu.core_type<tc>, window_params = [{transform_indices = @transform_0, window_bounds = array<i64: 2, 8, 256>}, {pipeline_mode = #tpu.pipeline_mode<synchronous>, transform_indices = @transform_1, window_bounds = array<i64: 4, 8>}, {pipeline_mode = #tpu.pipeline_mode<synchronous>, transform_indices = @transform_2, window_bounds = array<i64: 4, 1>}, {pipeline_mode = #tpu.pipeline_mode<synchronous>, transform_indices = @transform_3, window_bounds = array<i64: 8, 4>}, {pipeline_mode = #tpu.pipeline_mode<synchronous>, transform_indices = @transform_4, window_bounds = array<i64: 8, 1>}, {pipeline_mode = #tpu.pipeline_mode<synchronous>, transform_indices = @transform_5, window_bounds = array<i64: 7, 256>}, {transform_indices = @transform_6, window_bounds = array<i64: 98>}, {transform_indices = @transform_7, window_bounds = array<i64: 2, 8, 256>}]} {
    %c0 = arith.constant 0 : index
    %c0_0 = arith.constant 0 : index
    %c0_1 = arith.constant 0 : index
    %0 = vector.load %arg1[%c0, %c0_0, %c0_1] : memref<2x8x256xf32, #tpu.memory_space<vmem>>, vector<2x8x256xf32>
    %1 = vector.extract_strided_slice %0 {offsets = [0, 0, 0], sizes = [1, 8, 256], strides = [1, 1, 1]} : vector<2x8x256xf32> to vector<1x8x256xf32>
    %2 = vector.shape_cast %1 : vector<1x8x256xf32> to vector<8x256xf32>
    %cst = arith.constant dense<0xFF800000> : vector<8xf32>
    %3 = vector.multi_reduction <maximumf>, %2, %cst [1] : vector<8x256xf32> to vector<8xf32>
    %4 = vector.shape_cast %3 : vector<8xf32> to vector<8x1xf32>
    %c0_2 = arith.constant 0 : index
    %c0_3 = arith.constant 0 : index
    %5 = vector.load %arg10[%c0_2, %c0_3] : memref<8x4xf32, #tpu.memory_space<vmem>>, vector<8x1xf32>
    tpu.vector_store %arg10[%c0_2, %c0_3], %4 {strides = array<i32>} : memref<8x4xf32, #tpu.memory_space<vmem>>, vector<8x1xf32>,
    %cst_4 = arith.constant dense<0.000000e+00> : vector<8xf32>
    %6 = vector.multi_reduction <add>, %2, %cst_4 [1] : vector<8x256xf32> to vector<8xf32>
    %7 = vector.shape_cast %6 : vector<8xf32> to vector<8x1xf32>
    %cst_5 = arith.constant 2.560000e+02 : f32
    %8 = vector.broadcast %cst_5 : f32 to vector<8x1xf32>
    %9 = arith.divf %7, %8 : vector<8x1xf32>
    %c0_6 = arith.constant 0 : index
    %c2 = arith.constant 2 : index
    %10 = vector.load %arg10[%c0_6, %c2] : memref<8x4xf32, #tpu.memory_space<vmem>>, vector<8x1xf32>
    tpu.vector_store %arg10[%c0_6, %c2], %9 {strides = array<i32>} : memref<8x4xf32, #tpu.memory_space<vmem>>, vector<8x1xf32>,
    %11 = vector.extract_strided_slice %0 {offsets = [1, 0, 0], sizes = [1, 8, 256], strides = [1, 1, 1]} : vector<2x8x256xf32> to vector<1x8x256xf32>
    %12 = vector.shape_cast %11 : vector<1x8x256xf32> to vector<8x256xf32>
    %cst_7 = arith.constant dense<0xFF800000> : vector<8xf32>
    %13 = vector.multi_reduction <maximumf>, %12, %cst_7 [1] : vector<8x256xf32> to vector<8xf32>
    %14 = vector.shape_cast %13 : vector<8xf32> to vector<8x1xf32>
    %c0_8 = arith.constant 0 : index
    %c1 = arith.constant 1 : index
    %15 = vector.load %arg10[%c0_8, %c1] : memref<8x4xf32, #tpu.memory_space<vmem>>, vector<8x1xf32>
    tpu.vector_store %arg10[%c0_8, %c1], %14 {strides = array<i32>} : memref<8x4xf32, #tpu.memory_space<vmem>>, vector<8x1xf32>,
    %cst_9 = arith.constant dense<0.000000e+00> : vector<8xf32>
    %16 = vector.multi_reduction <add>, %12, %cst_9 [1] : vector<8x256xf32> to vector<8xf32>
    %17 = vector.shape_cast %16 : vector<8xf32> to vector<8x1xf32>
    %cst_10 = arith.constant 2.560000e+02 : f32
    %18 = vector.broadcast %cst_10 : f32 to vector<8x1xf32>
    %19 = arith.divf %17, %18 : vector<8x1xf32>
    %c0_11 = arith.constant 0 : index
    %c3 = arith.constant 3 : index
    %20 = vector.load %arg10[%c0_11, %c3] : memref<8x4xf32, #tpu.memory_space<vmem>>, vector<8x1xf32>
    tpu.vector_store %arg10[%c0_11, %c3], %19 {strides = array<i32>} : memref<8x4xf32, #tpu.memory_space<vmem>>, vector<8x1xf32>,
    %c0_12 = arith.constant 0 : index
    %c0_13 = arith.constant 0 : index
    %21 = vector.load %arg10[%c0_12, %c0_13] : memref<8x4xf32, #tpu.memory_space<vmem>>, vector<8x4xf32>
    %c0_14 = arith.constant 0 : index
    %c0_15 = arith.constant 0 : index
    %22 = vector.load %arg2[%c0_14, %c0_15] : memref<4x8xf32, #tpu.memory_space<vmem>>, vector<4x8xf32>
    %cst_16 = arith.constant dense<0.000000e+00> : vector<4x4xf32>
    %23 = tpu.matmul %22, %21, %cst_16 {dimension_numbers = #tpu.dot_dimension_numbers<[1], [0], [0], [1], [0, 0, 1, 1], [], []>} : vector<4x8xf32>, vector<8x4xf32>, vector<4x4xf32> -> vector<4x4xf32>
    %c0_17 = arith.constant 0 : index
    %c0_18 = arith.constant 0 : index
    %24 = vector.load %arg3[%c0_17, %c0_18] : memref<4x1xf32, #tpu.memory_space<vmem>>, vector<4x1xf32>
    %25 = vector.broadcast %24 : vector<4x1xf32> to vector<4x4xf32>
    %26 = arith.addf %23, %25 : vector<4x4xf32>
    %cst_19 = arith.constant 5.000000e-01 : f32
    %27 = vector.broadcast %cst_19 : f32 to vector<4x4xf32>
    %28 = arith.mulf %27, %26 : vector<4x4xf32>
    %cst_20 = arith.constant 1.41421354 : f32
    %29 = vector.broadcast %cst_20 : f32 to vector<4x4xf32>
    %30 = arith.divf %26, %29 : vector<4x4xf32>
    %31 = math.erf %30 : vector<4x4xf32>
    %cst_21 = arith.constant 1.000000e+00 : f32
    %32 = vector.broadcast %cst_21 : f32 to vector<4x4xf32>
    %33 = arith.addf %32, %31 : vector<4x4xf32>
    %34 = arith.mulf %28, %33 : vector<4x4xf32>
    %c0_22 = arith.constant 0 : index
    %c0_23 = arith.constant 0 : index
    %35 = vector.load %arg4[%c0_22, %c0_23] : memref<8x4xf32, #tpu.memory_space<vmem>>, vector<8x4xf32>
    %cst_24 = arith.constant dense<0.000000e+00> : vector<8x4xf32>
    %36 = tpu.matmul %35, %34, %cst_24 {dimension_numbers = #tpu.dot_dimension_numbers<[1], [0], [0], [1], [0, 0, 1, 1], [], []>} : vector<8x4xf32>, vector<4x4xf32>, vector<8x4xf32> -> vector<8x4xf32>
    %c0_25 = arith.constant 0 : index
    %c0_26 = arith.constant 0 : index
    %37 = vector.load %arg5[%c0_25, %c0_26] : memref<8x1xf32, #tpu.memory_space<vmem>>, vector<8x1xf32>
    %38 = vector.broadcast %37 : vector<8x1xf32> to vector<8x4xf32>
    %39 = arith.addf %36, %38 : vector<8x4xf32>
    %40 = vector.extract_strided_slice %39 {offsets = [0, 0], sizes = [8, 2], strides = [1, 1]} : vector<8x4xf32> to vector<8x2xf32>
    %41 = vector.extract_strided_slice %39 {offsets = [0, 2], sizes = [8, 2], strides = [1, 1]} : vector<8x4xf32> to vector<8x2xf32>
    %42 = arith.addf %40, %41 : vector<8x2xf32>
    %43 = arith.negf %42 : vector<8x2xf32>
    %44 = math.exp %43 : vector<8x2xf32>
    %cst_27 = arith.constant 1.000000e+00 : f32
    %45 = vector.broadcast %cst_27 : f32 to vector<8x2xf32>
    %46 = arith.addf %45, %44 : vector<8x2xf32>
    %47 = arith.divf %45, %46 : vector<8x2xf32>
    %cst_28 = arith.constant 0.000000e+00 : f32
    %48 = vector.broadcast %cst_28 : f32 to vector<2x2x384xf32>
    %c0_29 = arith.constant 0 : index
    %c0_30 = arith.constant 0 : index
    %c0_31 = arith.constant 0 : index
    %49 = vector.load %arg9[%c0_29, %c0_30, %c0_31] : memref<2x2x384xf32, #tpu.memory_space<vmem>>, vector<2x2x384xf32>
    tpu.vector_store %arg9[%c0_29, %c0_30, %c0_31], %48 {strides = array<i32>} : memref<2x2x384xf32, #tpu.memory_space<vmem>>, vector<2x2x384xf32>,
    %50 = vector.extract_strided_slice %0 {offsets = [0, 0, 0], sizes = [1, 8, 256], strides = [1, 1, 1]} : vector<2x8x256xf32> to vector<1x8x256xf32>
    %51 = vector.shape_cast %50 : vector<1x8x256xf32> to vector<8x256xf32>
    %52 = vector.extract_strided_slice %47 {offsets = [0, 0], sizes = [8, 1], strides = [1, 1]} : vector<8x2xf32> to vector<8x1xf32>
    %53 = vector.broadcast %52 : vector<8x1xf32> to vector<8x256xf32>
    %54 = arith.mulf %51, %53 : vector<8x256xf32>
    %cst_32 = arith.constant dense<0xFF800000> : vector<256xf32>
    %55 = vector.multi_reduction <maximumf>, %54, %cst_32 [0] : vector<8x256xf32> to vector<256xf32>
    %56 = vector.shape_cast %55 : vector<256xf32> to vector<1x256xf32>
    %c0_33 = arith.constant 0 : index
    %c0_34 = arith.constant 0 : index
    %c51 = arith.constant 51 : index
    %57 = vector.load %arg9[%c0_33, %c0_34, %c51] : memref<2x2x384xf32, #tpu.memory_space<vmem>>, vector<1x1x256xf32>
    %58 = vector.shape_cast %57 : vector<1x1x256xf32> to vector<1x256xf32>
    %59 = vector.shape_cast %56 : vector<1x256xf32> to vector<1x1x256xf32>
    tpu.vector_store %arg9[%c0_33, %c0_34, %c51], %59 {strides = array<i32>} : memref<2x2x384xf32, #tpu.memory_space<vmem>>, vector<1x1x256xf32>,
    %cst_35 = arith.constant dense<0.000000e+00> : vector<256xf32>
    %60 = vector.multi_reduction <add>, %54, %cst_35 [0] : vector<8x256xf32> to vector<256xf32>
    %61 = vector.shape_cast %60 : vector<256xf32> to vector<1x256xf32>
    %cst_36 = arith.constant 1.250000e-01 : f32
    %62 = vector.broadcast %cst_36 : f32 to vector<1x256xf32>
    %63 = arith.mulf %61, %62 : vector<1x256xf32>
    %c1_37 = arith.constant 1 : index
    %c0_38 = arith.constant 0 : index
    %c51_39 = arith.constant 51 : index
    %64 = vector.load %arg9[%c1_37, %c0_38, %c51_39] : memref<2x2x384xf32, #tpu.memory_space<vmem>>, vector<1x1x256xf32>
    %65 = vector.shape_cast %64 : vector<1x1x256xf32> to vector<1x256xf32>
    %66 = vector.shape_cast %63 : vector<1x256xf32> to vector<1x1x256xf32>
    tpu.vector_store %arg9[%c1_37, %c0_38, %c51_39], %66 {strides = array<i32>} : memref<2x2x384xf32, #tpu.memory_space<vmem>>, vector<1x1x256xf32>,
    %67 = vector.extract_strided_slice %0 {offsets = [1, 0, 0], sizes = [1, 8, 256], strides = [1, 1, 1]} : vector<2x8x256xf32> to vector<1x8x256xf32>
    %68 = vector.shape_cast %67 : vector<1x8x256xf32> to vector<8x256xf32>
    %69 = vector.extract_strided_slice %47 {offsets = [0, 1], sizes = [8, 1], strides = [1, 1]} : vector<8x2xf32> to vector<8x1xf32>
    %70 = vector.broadcast %69 : vector<8x1xf32> to vector<8x256xf32>
    %71 = arith.mulf %68, %70 : vector<8x256xf32>
    %cst_40 = arith.constant dense<0xFF800000> : vector<256xf32>
    %72 = vector.multi_reduction <maximumf>, %71, %cst_40 [0] : vector<8x256xf32> to vector<256xf32>
    %73 = vector.shape_cast %72 : vector<256xf32> to vector<1x256xf32>
    %c0_41 = arith.constant 0 : index
    %c1_42 = arith.constant 1 : index
    %c51_43 = arith.constant 51 : index
    %74 = vector.load %arg9[%c0_41, %c1_42, %c51_43] : memref<2x2x384xf32, #tpu.memory_space<vmem>>, vector<1x1x256xf32>
    %75 = vector.shape_cast %74 : vector<1x1x256xf32> to vector<1x256xf32>
    %76 = vector.shape_cast %73 : vector<1x256xf32> to vector<1x1x256xf32>
    tpu.vector_store %arg9[%c0_41, %c1_42, %c51_43], %76 {strides = array<i32>} : memref<2x2x384xf32, #tpu.memory_space<vmem>>, vector<1x1x256xf32>,
    %cst_44 = arith.constant dense<0.000000e+00> : vector<256xf32>
    %77 = vector.multi_reduction <add>, %71, %cst_44 [0] : vector<8x256xf32> to vector<256xf32>
    %78 = vector.shape_cast %77 : vector<256xf32> to vector<1x256xf32>
    %cst_45 = arith.constant 1.250000e-01 : f32
    %79 = vector.broadcast %cst_45 : f32 to vector<1x256xf32>
    %80 = arith.mulf %78, %79 : vector<1x256xf32>
    %c1_46 = arith.constant 1 : index
    %c1_47 = arith.constant 1 : index
    %c51_48 = arith.constant 51 : index
    %81 = vector.load %arg9[%c1_46, %c1_47, %c51_48] : memref<2x2x384xf32, #tpu.memory_space<vmem>>, vector<1x1x256xf32>
    %82 = vector.shape_cast %81 : vector<1x1x256xf32> to vector<1x256xf32>
    %83 = vector.shape_cast %80 : vector<1x256xf32> to vector<1x1x256xf32>
    tpu.vector_store %arg9[%c1_46, %c1_47, %c51_48], %83 {strides = array<i32>} : memref<2x2x384xf32, #tpu.memory_space<vmem>>, vector<1x1x256xf32>,
    %c0_49 = arith.constant 0 : index
    %c0_50 = arith.constant 0 : index
    %c0_51 = arith.constant 0 : index
    %84 = vector.load %arg9[%c0_49, %c0_50, %c0_51] : memref<2x2x384xf32, #tpu.memory_space<vmem>>, vector<1x2x384xf32>
    %85 = vector.shape_cast %84 : vector<1x2x384xf32> to vector<2x384xf32>
    %c1_52 = arith.constant 1 : index
    %c0_53 = arith.constant 0 : index
    %c0_54 = arith.constant 0 : index
    %86 = vector.load %arg9[%c1_52, %c0_53, %c0_54] : memref<2x2x384xf32, #tpu.memory_space<vmem>>, vector<1x2x384xf32>
    %87 = vector.shape_cast %86 : vector<1x2x384xf32> to vector<2x384xf32>
    %c0_55 = arith.constant 0 : index
    %c0_56 = arith.constant 0 : index
    %88 = vector.load %arg6[%c0_55, %c0_56] : memref<7x256xf32, #tpu.memory_space<vmem>>, vector<7x256xf32>
    %cst_57 = arith.constant 0.000000e+00 : f32
    %89 = vector.broadcast %cst_57 : f32 to vector<2x256xf32>
    %cst_58 = arith.constant 0.000000e+00 : f32
    %90 = vector.broadcast %cst_58 : f32 to vector<2x256xf32>
    %c0_59 = arith.constant 0 : index
    %91 = memref.load %arg7[%c0_59] : memref<98xf32, #tpu.memory_space<smem>>
    %92 = vector.extract_strided_slice %85 {offsets = [0, 0], sizes = [2, 256], strides = [1, 1]} : vector<2x384xf32> to vector<2x256xf32>
    %93 = vector.broadcast %91 : f32 to vector<2x256xf32>
    %94 = arith.mulf %93, %92 : vector<2x256xf32>
    %95 = arith.addf %90, %94 : vector<2x256xf32>
    %c7 = arith.constant 7 : index
    %96 = memref.load %arg7[%c7] : memref<98xf32, #tpu.memory_space<smem>>
    %97 = vector.extract_strided_slice %85 {offsets = [0, 16], sizes = [2, 256], strides = [1, 1]} : vector<2x384xf32> to vector<2x256xf32>
    %98 = vector.broadcast %96 : f32 to vector<2x256xf32>
    %99 = arith.mulf %98, %97 : vector<2x256xf32>
    %100 = arith.addf %95, %99 : vector<2x256xf32>
    %c14 = arith.constant 14 : index
    %101 = memref.load %arg7[%c14] : memref<98xf32, #tpu.memory_space<smem>>
    %102 = vector.extract_strided_slice %85 {offsets = [0, 32], sizes = [2, 256], strides = [1, 1]} : vector<2x384xf32> to vector<2x256xf32>
    %103 = vector.broadcast %101 : f32 to vector<2x256xf32>
    %104 = arith.mulf %103, %102 : vector<2x256xf32>
    %105 = arith.addf %100, %104 : vector<2x256xf32>
    %c21 = arith.constant 21 : index
    %106 = memref.load %arg7[%c21] : memref<98xf32, #tpu.memory_space<smem>>
    %107 = vector.extract_strided_slice %85 {offsets = [0, 48], sizes = [2, 256], strides = [1, 1]} : vector<2x384xf32> to vector<2x256xf32>
    %108 = vector.broadcast %106 : f32 to vector<2x256xf32>
    %109 = arith.mulf %108, %107 : vector<2x256xf32>
    %110 = arith.addf %105, %109 : vector<2x256xf32>
    %c28 = arith.constant 28 : index
    %111 = memref.load %arg7[%c28] : memref<98xf32, #tpu.memory_space<smem>>
    %112 = vector.extract_strided_slice %85 {offsets = [0, 64], sizes = [2, 256], strides = [1, 1]} : vector<2x384xf32> to vector<2x256xf32>
    %113 = vector.broadcast %111 : f32 to vector<2x256xf32>
    %114 = arith.mulf %113, %112 : vector<2x256xf32>
    %115 = arith.addf %110, %114 : vector<2x256xf32>
    %c35 = arith.constant 35 : index
    %116 = memref.load %arg7[%c35] : memref<98xf32, #tpu.memory_space<smem>>
    %117 = vector.extract_strided_slice %85 {offsets = [0, 80], sizes = [2, 256], strides = [1, 1]} : vector<2x384xf32> to vector<2x256xf32>
    %118 = vector.broadcast %116 : f32 to vector<2x256xf32>
    %119 = arith.mulf %118, %117 : vector<2x256xf32>
    %120 = arith.addf %115, %119 : vector<2x256xf32>
    %c42 = arith.constant 42 : index
    %121 = memref.load %arg7[%c42] : memref<98xf32, #tpu.memory_space<smem>>
    %122 = vector.extract_strided_slice %85 {offsets = [0, 96], sizes = [2, 256], strides = [1, 1]} : vector<2x384xf32> to vector<2x256xf32>
    %123 = vector.broadcast %121 : f32 to vector<2x256xf32>
    %124 = arith.mulf %123, %122 : vector<2x256xf32>
    %125 = arith.addf %120, %124 : vector<2x256xf32>
    %c49 = arith.constant 49 : index
    %126 = memref.load %arg7[%c49] : memref<98xf32, #tpu.memory_space<smem>>
    %127 = vector.extract_strided_slice %87 {offsets = [0, 0], sizes = [2, 256], strides = [1, 1]} : vector<2x384xf32> to vector<2x256xf32>
    %128 = vector.broadcast %126 : f32 to vector<2x256xf32>
    %129 = arith.mulf %128, %127 : vector<2x256xf32>
    %130 = arith.addf %125, %129 : vector<2x256xf32>
    %c56 = arith.constant 56 : index
    %131 = memref.load %arg7[%c56] : memref<98xf32, #tpu.memory_space<smem>>
    %132 = vector.extract_strided_slice %87 {offsets = [0, 16], sizes = [2, 256], strides = [1, 1]} : vector<2x384xf32> to vector<2x256xf32>
    %133 = vector.broadcast %131 : f32 to vector<2x256xf32>
    %134 = arith.mulf %133, %132 : vector<2x256xf32>
    %135 = arith.addf %130, %134 : vector<2x256xf32>
    %c63 = arith.constant 63 : index
    %136 = memref.load %arg7[%c63] : memref<98xf32, #tpu.memory_space<smem>>
    %137 = vector.extract_strided_slice %87 {offsets = [0, 32], sizes = [2, 256], strides = [1, 1]} : vector<2x384xf32> to vector<2x256xf32>
    %138 = vector.broadcast %136 : f32 to vector<2x256xf32>
    %139 = arith.mulf %138, %137 : vector<2x256xf32>
    %140 = arith.addf %135, %139 : vector<2x256xf32>
    %c70 = arith.constant 70 : index
    %141 = memref.load %arg7[%c70] : memref<98xf32, #tpu.memory_space<smem>>
    %142 = vector.extract_strided_slice %87 {offsets = [0, 48], sizes = [2, 256], strides = [1, 1]} : vector<2x384xf32> to vector<2x256xf32>
    %143 = vector.broadcast %141 : f32 to vector<2x256xf32>
    %144 = arith.mulf %143, %142 : vector<2x256xf32>
    %145 = arith.addf %140, %144 : vector<2x256xf32>
    %c77 = arith.constant 77 : index
    %146 = memref.load %arg7[%c77] : memref<98xf32, #tpu.memory_space<smem>>
    %147 = vector.extract_strided_slice %87 {offsets = [0, 64], sizes = [2, 256], strides = [1, 1]} : vector<2x384xf32> to vector<2x256xf32>
    %148 = vector.broadcast %146 : f32 to vector<2x256xf32>
    %149 = arith.mulf %148, %147 : vector<2x256xf32>
    %150 = arith.addf %145, %149 : vector<2x256xf32>
    %c84 = arith.constant 84 : index
    %151 = memref.load %arg7[%c84] : memref<98xf32, #tpu.memory_space<smem>>
    %152 = vector.extract_strided_slice %87 {offsets = [0, 80], sizes = [2, 256], strides = [1, 1]} : vector<2x384xf32> to vector<2x256xf32>
    %153 = vector.broadcast %151 : f32 to vector<2x256xf32>
    %154 = arith.mulf %153, %152 : vector<2x256xf32>
    %155 = arith.addf %150, %154 : vector<2x256xf32>
    %c91 = arith.constant 91 : index
    %156 = memref.load %arg7[%c91] : memref<98xf32, #tpu.memory_space<smem>>
    %157 = vector.extract_strided_slice %87 {offsets = [0, 96], sizes = [2, 256], strides = [1, 1]} : vector<2x384xf32> to vector<2x256xf32>
    %158 = vector.broadcast %156 : f32 to vector<2x256xf32>
    %159 = arith.mulf %158, %157 : vector<2x256xf32>
    %160 = arith.addf %155, %159 : vector<2x256xf32>
    %161 = vector.extract_strided_slice %88 {offsets = [0, 0], sizes = [1, 256], strides = [1, 1]} : vector<7x256xf32> to vector<1x256xf32>
    %162 = vector.broadcast %161 : vector<1x256xf32> to vector<2x256xf32>
    %163 = arith.mulf %162, %160 : vector<2x256xf32>
    %164 = arith.addf %89, %163 : vector<2x256xf32>
    %cst_60 = arith.constant 0.000000e+00 : f32
    %165 = vector.broadcast %cst_60 : f32 to vector<2x256xf32>
    %c1_61 = arith.constant 1 : index
    %166 = memref.load %arg7[%c1_61] : memref<98xf32, #tpu.memory_space<smem>>
    %167 = vector.extract_strided_slice %85 {offsets = [0, 1], sizes = [2, 256], strides = [1, 1]} : vector<2x384xf32> to vector<2x256xf32>
    %168 = vector.broadcast %166 : f32 to vector<2x256xf32>
    %169 = arith.mulf %168, %167 : vector<2x256xf32>
    %170 = arith.addf %165, %169 : vector<2x256xf32>
    %c8 = arith.constant 8 : index
    %171 = memref.load %arg7[%c8] : memref<98xf32, #tpu.memory_space<smem>>
    %172 = vector.extract_strided_slice %85 {offsets = [0, 17], sizes = [2, 256], strides = [1, 1]} : vector<2x384xf32> to vector<2x256xf32>
    %173 = vector.broadcast %171 : f32 to vector<2x256xf32>
    %174 = arith.mulf %173, %172 : vector<2x256xf32>
    %175 = arith.addf %170, %174 : vector<2x256xf32>
    %c15 = arith.constant 15 : index
    %176 = memref.load %arg7[%c15] : memref<98xf32, #tpu.memory_space<smem>>
    %177 = vector.extract_strided_slice %85 {offsets = [0, 33], sizes = [2, 256], strides = [1, 1]} : vector<2x384xf32> to vector<2x256xf32>
    %178 = vector.broadcast %176 : f32 to vector<2x256xf32>
    %179 = arith.mulf %178, %177 : vector<2x256xf32>
    %180 = arith.addf %175, %179 : vector<2x256xf32>
    %c22 = arith.constant 22 : index
    %181 = memref.load %arg7[%c22] : memref<98xf32, #tpu.memory_space<smem>>
    %182 = vector.extract_strided_slice %85 {offsets = [0, 49], sizes = [2, 256], strides = [1, 1]} : vector<2x384xf32> to vector<2x256xf32>
    %183 = vector.broadcast %181 : f32 to vector<2x256xf32>
    %184 = arith.mulf %183, %182 : vector<2x256xf32>
    %185 = arith.addf %180, %184 : vector<2x256xf32>
    %c29 = arith.constant 29 : index
    %186 = memref.load %arg7[%c29] : memref<98xf32, #tpu.memory_space<smem>>
    %187 = vector.extract_strided_slice %85 {offsets = [0, 65], sizes = [2, 256], strides = [1, 1]} : vector<2x384xf32> to vector<2x256xf32>
    %188 = vector.broadcast %186 : f32 to vector<2x256xf32>
    %189 = arith.mulf %188, %187 : vector<2x256xf32>
    %190 = arith.addf %185, %189 : vector<2x256xf32>
    %c36 = arith.constant 36 : index
    %191 = memref.load %arg7[%c36] : memref<98xf32, #tpu.memory_space<smem>>
    %192 = vector.extract_strided_slice %85 {offsets = [0, 81], sizes = [2, 256], strides = [1, 1]} : vector<2x384xf32> to vector<2x256xf32>
    %193 = vector.broadcast %191 : f32 to vector<2x256xf32>
    %194 = arith.mulf %193, %192 : vector<2x256xf32>
    %195 = arith.addf %190, %194 : vector<2x256xf32>
    %c43 = arith.constant 43 : index
    %196 = memref.load %arg7[%c43] : memref<98xf32, #tpu.memory_space<smem>>
    %197 = vector.extract_strided_slice %85 {offsets = [0, 97], sizes = [2, 256], strides = [1, 1]} : vector<2x384xf32> to vector<2x256xf32>
    %198 = vector.broadcast %196 : f32 to vector<2x256xf32>
    %199 = arith.mulf %198, %197 : vector<2x256xf32>
    %200 = arith.addf %195, %199 : vector<2x256xf32>
    %c50 = arith.constant 50 : index
    %201 = memref.load %arg7[%c50] : memref<98xf32, #tpu.memory_space<smem>>
    %202 = vector.extract_strided_slice %87 {offsets = [0, 1], sizes = [2, 256], strides = [1, 1]} : vector<2x384xf32> to vector<2x256xf32>
    %203 = vector.broadcast %201 : f32 to vector<2x256xf32>
    %204 = arith.mulf %203, %202 : vector<2x256xf32>
    %205 = arith.addf %200, %204 : vector<2x256xf32>
    %c57 = arith.constant 57 : index
    %206 = memref.load %arg7[%c57] : memref<98xf32, #tpu.memory_space<smem>>
    %207 = vector.extract_strided_slice %87 {offsets = [0, 17], sizes = [2, 256], strides = [1, 1]} : vector<2x384xf32> to vector<2x256xf32>
    %208 = vector.broadcast %206 : f32 to vector<2x256xf32>
    %209 = arith.mulf %208, %207 : vector<2x256xf32>
    %210 = arith.addf %205, %209 : vector<2x256xf32>
    %c64 = arith.constant 64 : index
    %211 = memref.load %arg7[%c64] : memref<98xf32, #tpu.memory_space<smem>>
    %212 = vector.extract_strided_slice %87 {offsets = [0, 33], sizes = [2, 256], strides = [1, 1]} : vector<2x384xf32> to vector<2x256xf32>
    %213 = vector.broadcast %211 : f32 to vector<2x256xf32>
    %214 = arith.mulf %213, %212 : vector<2x256xf32>
    %215 = arith.addf %210, %214 : vector<2x256xf32>
    %c71 = arith.constant 71 : index
    %216 = memref.load %arg7[%c71] : memref<98xf32, #tpu.memory_space<smem>>
    %217 = vector.extract_strided_slice %87 {offsets = [0, 49], sizes = [2, 256], strides = [1, 1]} : vector<2x384xf32> to vector<2x256xf32>
    %218 = vector.broadcast %216 : f32 to vector<2x256xf32>
    %219 = arith.mulf %218, %217 : vector<2x256xf32>
    %220 = arith.addf %215, %219 : vector<2x256xf32>
    %c78 = arith.constant 78 : index
    %221 = memref.load %arg7[%c78] : memref<98xf32, #tpu.memory_space<smem>>
    %222 = vector.extract_strided_slice %87 {offsets = [0, 65], sizes = [2, 256], strides = [1, 1]} : vector<2x384xf32> to vector<2x256xf32>
    %223 = vector.broadcast %221 : f32 to vector<2x256xf32>
    %224 = arith.mulf %223, %222 : vector<2x256xf32>
    %225 = arith.addf %220, %224 : vector<2x256xf32>
    %c85 = arith.constant 85 : index
    %226 = memref.load %arg7[%c85] : memref<98xf32, #tpu.memory_space<smem>>
    %227 = vector.extract_strided_slice %87 {offsets = [0, 81], sizes = [2, 256], strides = [1, 1]} : vector<2x384xf32> to vector<2x256xf32>
    %228 = vector.broadcast %226 : f32 to vector<2x256xf32>
    %229 = arith.mulf %228, %227 : vector<2x256xf32>
    %230 = arith.addf %225, %229 : vector<2x256xf32>
    %c92 = arith.constant 92 : index
    %231 = memref.load %arg7[%c92] : memref<98xf32, #tpu.memory_space<smem>>
    %232 = vector.extract_strided_slice %87 {offsets = [0, 97], sizes = [2, 256], strides = [1, 1]} : vector<2x384xf32> to vector<2x256xf32>
    %233 = vector.broadcast %231 : f32 to vector<2x256xf32>
    %234 = arith.mulf %233, %232 : vector<2x256xf32>
    %235 = arith.addf %230, %234 : vector<2x256xf32>
    %236 = vector.extract_strided_slice %88 {offsets = [1, 0], sizes = [1, 256], strides = [1, 1]} : vector<7x256xf32> to vector<1x256xf32>
    %237 = vector.broadcast %236 : vector<1x256xf32> to vector<2x256xf32>
    %238 = arith.mulf %237, %235 : vector<2x256xf32>
    %239 = arith.addf %164, %238 : vector<2x256xf32>
    %cst_62 = arith.constant 0.000000e+00 : f32
    %240 = vector.broadcast %cst_62 : f32 to vector<2x256xf32>
    %c2_63 = arith.constant 2 : index
    %241 = memref.load %arg7[%c2_63] : memref<98xf32, #tpu.memory_space<smem>>
    %242 = vector.extract_strided_slice %85 {offsets = [0, 2], sizes = [2, 256], strides = [1, 1]} : vector<2x384xf32> to vector<2x256xf32>
    %243 = vector.broadcast %241 : f32 to vector<2x256xf32>
    %244 = arith.mulf %243, %242 : vector<2x256xf32>
    %245 = arith.addf %240, %244 : vector<2x256xf32>
    %c9 = arith.constant 9 : index
    %246 = memref.load %arg7[%c9] : memref<98xf32, #tpu.memory_space<smem>>
    %247 = vector.extract_strided_slice %85 {offsets = [0, 18], sizes = [2, 256], strides = [1, 1]} : vector<2x384xf32> to vector<2x256xf32>
    %248 = vector.broadcast %246 : f32 to vector<2x256xf32>
    %249 = arith.mulf %248, %247 : vector<2x256xf32>
    %250 = arith.addf %245, %249 : vector<2x256xf32>
    %c16 = arith.constant 16 : index
    %251 = memref.load %arg7[%c16] : memref<98xf32, #tpu.memory_space<smem>>
    %252 = vector.extract_strided_slice %85 {offsets = [0, 34], sizes = [2, 256], strides = [1, 1]} : vector<2x384xf32> to vector<2x256xf32>
    %253 = vector.broadcast %251 : f32 to vector<2x256xf32>
    %254 = arith.mulf %253, %252 : vector<2x256xf32>
    %255 = arith.addf %250, %254 : vector<2x256xf32>
    %c23 = arith.constant 23 : index
    %256 = memref.load %arg7[%c23] : memref<98xf32, #tpu.memory_space<smem>>
    %257 = vector.extract_strided_slice %85 {offsets = [0, 50], sizes = [2, 256], strides = [1, 1]} : vector<2x384xf32> to vector<2x256xf32>
    %258 = vector.broadcast %256 : f32 to vector<2x256xf32>
    %259 = arith.mulf %258, %257 : vector<2x256xf32>
    %260 = arith.addf %255, %259 : vector<2x256xf32>
    %c30 = arith.constant 30 : index
    %261 = memref.load %arg7[%c30] : memref<98xf32, #tpu.memory_space<smem>>
    %262 = vector.extract_strided_slice %85 {offsets = [0, 66], sizes = [2, 256], strides = [1, 1]} : vector<2x384xf32> to vector<2x256xf32>
    %263 = vector.broadcast %261 : f32 to vector<2x256xf32>
    %264 = arith.mulf %263, %262 : vector<2x256xf32>
    %265 = arith.addf %260, %264 : vector<2x256xf32>
    %c37 = arith.constant 37 : index
    %266 = memref.load %arg7[%c37] : memref<98xf32, #tpu.memory_space<smem>>
    %267 = vector.extract_strided_slice %85 {offsets = [0, 82], sizes = [2, 256], strides = [1, 1]} : vector<2x384xf32> to vector<2x256xf32>
    %268 = vector.broadcast %266 : f32 to vector<2x256xf32>
    %269 = arith.mulf %268, %267 : vector<2x256xf32>
    %270 = arith.addf %265, %269 : vector<2x256xf32>
    %c44 = arith.constant 44 : index
    %271 = memref.load %arg7[%c44] : memref<98xf32, #tpu.memory_space<smem>>
    %272 = vector.extract_strided_slice %85 {offsets = [0, 98], sizes = [2, 256], strides = [1, 1]} : vector<2x384xf32> to vector<2x256xf32>
    %273 = vector.broadcast %271 : f32 to vector<2x256xf32>
    %274 = arith.mulf %273, %272 : vector<2x256xf32>
    %275 = arith.addf %270, %274 : vector<2x256xf32>
    %c51_64 = arith.constant 51 : index
    %276 = memref.load %arg7[%c51_64] : memref<98xf32, #tpu.memory_space<smem>>
    %277 = vector.extract_strided_slice %87 {offsets = [0, 2], sizes = [2, 256], strides = [1, 1]} : vector<2x384xf32> to vector<2x256xf32>
    %278 = vector.broadcast %276 : f32 to vector<2x256xf32>
    %279 = arith.mulf %278, %277 : vector<2x256xf32>
    %280 = arith.addf %275, %279 : vector<2x256xf32>
    %c58 = arith.constant 58 : index
    %281 = memref.load %arg7[%c58] : memref<98xf32, #tpu.memory_space<smem>>
    %282 = vector.extract_strided_slice %87 {offsets = [0, 18], sizes = [2, 256], strides = [1, 1]} : vector<2x384xf32> to vector<2x256xf32>
    %283 = vector.broadcast %281 : f32 to vector<2x256xf32>
    %284 = arith.mulf %283, %282 : vector<2x256xf32>
    %285 = arith.addf %280, %284 : vector<2x256xf32>
    %c65 = arith.constant 65 : index
    %286 = memref.load %arg7[%c65] : memref<98xf32, #tpu.memory_space<smem>>
    %287 = vector.extract_strided_slice %87 {offsets = [0, 34], sizes = [2, 256], strides = [1, 1]} : vector<2x384xf32> to vector<2x256xf32>
    %288 = vector.broadcast %286 : f32 to vector<2x256xf32>
    %289 = arith.mulf %288, %287 : vector<2x256xf32>
    %290 = arith.addf %285, %289 : vector<2x256xf32>
    %c72 = arith.constant 72 : index
    %291 = memref.load %arg7[%c72] : memref<98xf32, #tpu.memory_space<smem>>
    %292 = vector.extract_strided_slice %87 {offsets = [0, 50], sizes = [2, 256], strides = [1, 1]} : vector<2x384xf32> to vector<2x256xf32>
    %293 = vector.broadcast %291 : f32 to vector<2x256xf32>
    %294 = arith.mulf %293, %292 : vector<2x256xf32>
    %295 = arith.addf %290, %294 : vector<2x256xf32>
    %c79 = arith.constant 79 : index
    %296 = memref.load %arg7[%c79] : memref<98xf32, #tpu.memory_space<smem>>
    %297 = vector.extract_strided_slice %87 {offsets = [0, 66], sizes = [2, 256], strides = [1, 1]} : vector<2x384xf32> to vector<2x256xf32>
    %298 = vector.broadcast %296 : f32 to vector<2x256xf32>
    %299 = arith.mulf %298, %297 : vector<2x256xf32>
    %300 = arith.addf %295, %299 : vector<2x256xf32>
    %c86 = arith.constant 86 : index
    %301 = memref.load %arg7[%c86] : memref<98xf32, #tpu.memory_space<smem>>
    %302 = vector.extract_strided_slice %87 {offsets = [0, 82], sizes = [2, 256], strides = [1, 1]} : vector<2x384xf32> to vector<2x256xf32>
    %303 = vector.broadcast %301 : f32 to vector<2x256xf32>
    %304 = arith.mulf %303, %302 : vector<2x256xf32>
    %305 = arith.addf %300, %304 : vector<2x256xf32>
    %c93 = arith.constant 93 : index
    %306 = memref.load %arg7[%c93] : memref<98xf32, #tpu.memory_space<smem>>
    %307 = vector.extract_strided_slice %87 {offsets = [0, 98], sizes = [2, 256], strides = [1, 1]} : vector<2x384xf32> to vector<2x256xf32>
    %308 = vector.broadcast %306 : f32 to vector<2x256xf32>
    %309 = arith.mulf %308, %307 : vector<2x256xf32>
    %310 = arith.addf %305, %309 : vector<2x256xf32>
    %311 = vector.extract_strided_slice %88 {offsets = [2, 0], sizes = [1, 256], strides = [1, 1]} : vector<7x256xf32> to vector<1x256xf32>
    %312 = vector.broadcast %311 : vector<1x256xf32> to vector<2x256xf32>
    %313 = arith.mulf %312, %310 : vector<2x256xf32>
    %314 = arith.addf %239, %313 : vector<2x256xf32>
    %cst_65 = arith.constant 0.000000e+00 : f32
    %315 = vector.broadcast %cst_65 : f32 to vector<2x256xf32>
    %c3_66 = arith.constant 3 : index
    %316 = memref.load %arg7[%c3_66] : memref<98xf32, #tpu.memory_space<smem>>
    %317 = vector.extract_strided_slice %85 {offsets = [0, 3], sizes = [2, 256], strides = [1, 1]} : vector<2x384xf32> to vector<2x256xf32>
    %318 = vector.broadcast %316 : f32 to vector<2x256xf32>
    %319 = arith.mulf %318, %317 : vector<2x256xf32>
    %320 = arith.addf %315, %319 : vector<2x256xf32>
    %c10 = arith.constant 10 : index
    %321 = memref.load %arg7[%c10] : memref<98xf32, #tpu.memory_space<smem>>
    %322 = vector.extract_strided_slice %85 {offsets = [0, 19], sizes = [2, 256], strides = [1, 1]} : vector<2x384xf32> to vector<2x256xf32>
    %323 = vector.broadcast %321 : f32 to vector<2x256xf32>
    %324 = arith.mulf %323, %322 : vector<2x256xf32>
    %325 = arith.addf %320, %324 : vector<2x256xf32>
    %c17 = arith.constant 17 : index
    %326 = memref.load %arg7[%c17] : memref<98xf32, #tpu.memory_space<smem>>
    %327 = vector.extract_strided_slice %85 {offsets = [0, 35], sizes = [2, 256], strides = [1, 1]} : vector<2x384xf32> to vector<2x256xf32>
    %328 = vector.broadcast %326 : f32 to vector<2x256xf32>
    %329 = arith.mulf %328, %327 : vector<2x256xf32>
    %330 = arith.addf %325, %329 : vector<2x256xf32>
    %c24 = arith.constant 24 : index
    %331 = memref.load %arg7[%c24] : memref<98xf32, #tpu.memory_space<smem>>
    %332 = vector.extract_strided_slice %85 {offsets = [0, 51], sizes = [2, 256], strides = [1, 1]} : vector<2x384xf32> to vector<2x256xf32>
    %333 = vector.broadcast %331 : f32 to vector<2x256xf32>
    %334 = arith.mulf %333, %332 : vector<2x256xf32>
    %335 = arith.addf %330, %334 : vector<2x256xf32>
    %c31 = arith.constant 31 : index
    %336 = memref.load %arg7[%c31] : memref<98xf32, #tpu.memory_space<smem>>
    %337 = vector.extract_strided_slice %85 {offsets = [0, 67], sizes = [2, 256], strides = [1, 1]} : vector<2x384xf32> to vector<2x256xf32>
    %338 = vector.broadcast %336 : f32 to vector<2x256xf32>
    %339 = arith.mulf %338, %337 : vector<2x256xf32>
    %340 = arith.addf %335, %339 : vector<2x256xf32>
    %c38 = arith.constant 38 : index
    %341 = memref.load %arg7[%c38] : memref<98xf32, #tpu.memory_space<smem>>
    %342 = vector.extract_strided_slice %85 {offsets = [0, 83], sizes = [2, 256], strides = [1, 1]} : vector<2x384xf32> to vector<2x256xf32>
    %343 = vector.broadcast %341 : f32 to vector<2x256xf32>
    %344 = arith.mulf %343, %342 : vector<2x256xf32>
    %345 = arith.addf %340, %344 : vector<2x256xf32>
    %c45 = arith.constant 45 : index
    %346 = memref.load %arg7[%c45] : memref<98xf32, #tpu.memory_space<smem>>
    %347 = vector.extract_strided_slice %85 {offsets = [0, 99], sizes = [2, 256], strides = [1, 1]} : vector<2x384xf32> to vector<2x256xf32>
    %348 = vector.broadcast %346 : f32 to vector<2x256xf32>
    %349 = arith.mulf %348, %347 : vector<2x256xf32>
    %350 = arith.addf %345, %349 : vector<2x256xf32>
    %c52 = arith.constant 52 : index
    %351 = memref.load %arg7[%c52] : memref<98xf32, #tpu.memory_space<smem>>
    %352 = vector.extract_strided_slice %87 {offsets = [0, 3], sizes = [2, 256], strides = [1, 1]} : vector<2x384xf32> to vector<2x256xf32>
    %353 = vector.broadcast %351 : f32 to vector<2x256xf32>
    %354 = arith.mulf %353, %352 : vector<2x256xf32>
    %355 = arith.addf %350, %354 : vector<2x256xf32>
    %c59 = arith.constant 59 : index
    %356 = memref.load %arg7[%c59] : memref<98xf32, #tpu.memory_space<smem>>
    %357 = vector.extract_strided_slice %87 {offsets = [0, 19], sizes = [2, 256], strides = [1, 1]} : vector<2x384xf32> to vector<2x256xf32>
    %358 = vector.broadcast %356 : f32 to vector<2x256xf32>
    %359 = arith.mulf %358, %357 : vector<2x256xf32>
    %360 = arith.addf %355, %359 : vector<2x256xf32>
    %c66 = arith.constant 66 : index
    %361 = memref.load %arg7[%c66] : memref<98xf32, #tpu.memory_space<smem>>
    %362 = vector.extract_strided_slice %87 {offsets = [0, 35], sizes = [2, 256], strides = [1, 1]} : vector<2x384xf32> to vector<2x256xf32>
    %363 = vector.broadcast %361 : f32 to vector<2x256xf32>
    %364 = arith.mulf %363, %362 : vector<2x256xf32>
    %365 = arith.addf %360, %364 : vector<2x256xf32>
    %c73 = arith.constant 73 : index
    %366 = memref.load %arg7[%c73] : memref<98xf32, #tpu.memory_space<smem>>
    %367 = vector.extract_strided_slice %87 {offsets = [0, 51], sizes = [2, 256], strides = [1, 1]} : vector<2x384xf32> to vector<2x256xf32>
    %368 = vector.broadcast %366 : f32 to vector<2x256xf32>
    %369 = arith.mulf %368, %367 : vector<2x256xf32>
    %370 = arith.addf %365, %369 : vector<2x256xf32>
    %c80 = arith.constant 80 : index
    %371 = memref.load %arg7[%c80] : memref<98xf32, #tpu.memory_space<smem>>
    %372 = vector.extract_strided_slice %87 {offsets = [0, 67], sizes = [2, 256], strides = [1, 1]} : vector<2x384xf32> to vector<2x256xf32>
    %373 = vector.broadcast %371 : f32 to vector<2x256xf32>
    %374 = arith.mulf %373, %372 : vector<2x256xf32>
    %375 = arith.addf %370, %374 : vector<2x256xf32>
    %c87 = arith.constant 87 : index
    %376 = memref.load %arg7[%c87] : memref<98xf32, #tpu.memory_space<smem>>
    %377 = vector.extract_strided_slice %87 {offsets = [0, 83], sizes = [2, 256], strides = [1, 1]} : vector<2x384xf32> to vector<2x256xf32>
    %378 = vector.broadcast %376 : f32 to vector<2x256xf32>
    %379 = arith.mulf %378, %377 : vector<2x256xf32>
    %380 = arith.addf %375, %379 : vector<2x256xf32>
    %c94 = arith.constant 94 : index
    %381 = memref.load %arg7[%c94] : memref<98xf32, #tpu.memory_space<smem>>
    %382 = vector.extract_strided_slice %87 {offsets = [0, 99], sizes = [2, 256], strides = [1, 1]} : vector<2x384xf32> to vector<2x256xf32>
    %383 = vector.broadcast %381 : f32 to vector<2x256xf32>
    %384 = arith.mulf %383, %382 : vector<2x256xf32>
    %385 = arith.addf %380, %384 : vector<2x256xf32>
    %386 = vector.extract_strided_slice %88 {offsets = [3, 0], sizes = [1, 256], strides = [1, 1]} : vector<7x256xf32> to vector<1x256xf32>
    %387 = vector.broadcast %386 : vector<1x256xf32> to vector<2x256xf32>
    %388 = arith.mulf %387, %385 : vector<2x256xf32>
    %389 = arith.addf %314, %388 : vector<2x256xf32>
    %cst_67 = arith.constant 0.000000e+00 : f32
    %390 = vector.broadcast %cst_67 : f32 to vector<2x256xf32>
    %c4 = arith.constant 4 : index
    %391 = memref.load %arg7[%c4] : memref<98xf32, #tpu.memory_space<smem>>
    %392 = vector.extract_strided_slice %85 {offsets = [0, 4], sizes = [2, 256], strides = [1, 1]} : vector<2x384xf32> to vector<2x256xf32>
    %393 = vector.broadcast %391 : f32 to vector<2x256xf32>
    %394 = arith.mulf %393, %392 : vector<2x256xf32>
    %395 = arith.addf %390, %394 : vector<2x256xf32>
    %c11 = arith.constant 11 : index
    %396 = memref.load %arg7[%c11] : memref<98xf32, #tpu.memory_space<smem>>
    %397 = vector.extract_strided_slice %85 {offsets = [0, 20], sizes = [2, 256], strides = [1, 1]} : vector<2x384xf32> to vector<2x256xf32>
    %398 = vector.broadcast %396 : f32 to vector<2x256xf32>
    %399 = arith.mulf %398, %397 : vector<2x256xf32>
    %400 = arith.addf %395, %399 : vector<2x256xf32>
    %c18 = arith.constant 18 : index
    %401 = memref.load %arg7[%c18] : memref<98xf32, #tpu.memory_space<smem>>
    %402 = vector.extract_strided_slice %85 {offsets = [0, 36], sizes = [2, 256], strides = [1, 1]} : vector<2x384xf32> to vector<2x256xf32>
    %403 = vector.broadcast %401 : f32 to vector<2x256xf32>
    %404 = arith.mulf %403, %402 : vector<2x256xf32>
    %405 = arith.addf %400, %404 : vector<2x256xf32>
    %c25 = arith.constant 25 : index
    %406 = memref.load %arg7[%c25] : memref<98xf32, #tpu.memory_space<smem>>
    %407 = vector.extract_strided_slice %85 {offsets = [0, 52], sizes = [2, 256], strides = [1, 1]} : vector<2x384xf32> to vector<2x256xf32>
    %408 = vector.broadcast %406 : f32 to vector<2x256xf32>
    %409 = arith.mulf %408, %407 : vector<2x256xf32>
    %410 = arith.addf %405, %409 : vector<2x256xf32>
    %c32 = arith.constant 32 : index
    %411 = memref.load %arg7[%c32] : memref<98xf32, #tpu.memory_space<smem>>
    %412 = vector.extract_strided_slice %85 {offsets = [0, 68], sizes = [2, 256], strides = [1, 1]} : vector<2x384xf32> to vector<2x256xf32>
    %413 = vector.broadcast %411 : f32 to vector<2x256xf32>
    %414 = arith.mulf %413, %412 : vector<2x256xf32>
    %415 = arith.addf %410, %414 : vector<2x256xf32>
    %c39 = arith.constant 39 : index
    %416 = memref.load %arg7[%c39] : memref<98xf32, #tpu.memory_space<smem>>
    %417 = vector.extract_strided_slice %85 {offsets = [0, 84], sizes = [2, 256], strides = [1, 1]} : vector<2x384xf32> to vector<2x256xf32>
    %418 = vector.broadcast %416 : f32 to vector<2x256xf32>
    %419 = arith.mulf %418, %417 : vector<2x256xf32>
    %420 = arith.addf %415, %419 : vector<2x256xf32>
    %c46 = arith.constant 46 : index
    %421 = memref.load %arg7[%c46] : memref<98xf32, #tpu.memory_space<smem>>
    %422 = vector.extract_strided_slice %85 {offsets = [0, 100], sizes = [2, 256], strides = [1, 1]} : vector<2x384xf32> to vector<2x256xf32>
    %423 = vector.broadcast %421 : f32 to vector<2x256xf32>
    %424 = arith.mulf %423, %422 : vector<2x256xf32>
    %425 = arith.addf %420, %424 : vector<2x256xf32>
    %c53 = arith.constant 53 : index
    %426 = memref.load %arg7[%c53] : memref<98xf32, #tpu.memory_space<smem>>
    %427 = vector.extract_strided_slice %87 {offsets = [0, 4], sizes = [2, 256], strides = [1, 1]} : vector<2x384xf32> to vector<2x256xf32>
    %428 = vector.broadcast %426 : f32 to vector<2x256xf32>
    %429 = arith.mulf %428, %427 : vector<2x256xf32>
    %430 = arith.addf %425, %429 : vector<2x256xf32>
    %c60 = arith.constant 60 : index
    %431 = memref.load %arg7[%c60] : memref<98xf32, #tpu.memory_space<smem>>
    %432 = vector.extract_strided_slice %87 {offsets = [0, 20], sizes = [2, 256], strides = [1, 1]} : vector<2x384xf32> to vector<2x256xf32>
    %433 = vector.broadcast %431 : f32 to vector<2x256xf32>
    %434 = arith.mulf %433, %432 : vector<2x256xf32>
    %435 = arith.addf %430, %434 : vector<2x256xf32>
    %c67 = arith.constant 67 : index
    %436 = memref.load %arg7[%c67] : memref<98xf32, #tpu.memory_space<smem>>
    %437 = vector.extract_strided_slice %87 {offsets = [0, 36], sizes = [2, 256], strides = [1, 1]} : vector<2x384xf32> to vector<2x256xf32>
    %438 = vector.broadcast %436 : f32 to vector<2x256xf32>
    %439 = arith.mulf %438, %437 : vector<2x256xf32>
    %440 = arith.addf %435, %439 : vector<2x256xf32>
    %c74 = arith.constant 74 : index
    %441 = memref.load %arg7[%c74] : memref<98xf32, #tpu.memory_space<smem>>
    %442 = vector.extract_strided_slice %87 {offsets = [0, 52], sizes = [2, 256], strides = [1, 1]} : vector<2x384xf32> to vector<2x256xf32>
    %443 = vector.broadcast %441 : f32 to vector<2x256xf32>
    %444 = arith.mulf %443, %442 : vector<2x256xf32>
    %445 = arith.addf %440, %444 : vector<2x256xf32>
    %c81 = arith.constant 81 : index
    %446 = memref.load %arg7[%c81] : memref<98xf32, #tpu.memory_space<smem>>
    %447 = vector.extract_strided_slice %87 {offsets = [0, 68], sizes = [2, 256], strides = [1, 1]} : vector<2x384xf32> to vector<2x256xf32>
    %448 = vector.broadcast %446 : f32 to vector<2x256xf32>
    %449 = arith.mulf %448, %447 : vector<2x256xf32>
    %450 = arith.addf %445, %449 : vector<2x256xf32>
    %c88 = arith.constant 88 : index
    %451 = memref.load %arg7[%c88] : memref<98xf32, #tpu.memory_space<smem>>
    %452 = vector.extract_strided_slice %87 {offsets = [0, 84], sizes = [2, 256], strides = [1, 1]} : vector<2x384xf32> to vector<2x256xf32>
    %453 = vector.broadcast %451 : f32 to vector<2x256xf32>
    %454 = arith.mulf %453, %452 : vector<2x256xf32>
    %455 = arith.addf %450, %454 : vector<2x256xf32>
    %c95 = arith.constant 95 : index
    %456 = memref.load %arg7[%c95] : memref<98xf32, #tpu.memory_space<smem>>
    %457 = vector.extract_strided_slice %87 {offsets = [0, 100], sizes = [2, 256], strides = [1, 1]} : vector<2x384xf32> to vector<2x256xf32>
    %458 = vector.broadcast %456 : f32 to vector<2x256xf32>
    %459 = arith.mulf %458, %457 : vector<2x256xf32>
    %460 = arith.addf %455, %459 : vector<2x256xf32>
    %461 = vector.extract_strided_slice %88 {offsets = [4, 0], sizes = [1, 256], strides = [1, 1]} : vector<7x256xf32> to vector<1x256xf32>
    %462 = vector.broadcast %461 : vector<1x256xf32> to vector<2x256xf32>
    %463 = arith.mulf %462, %460 : vector<2x256xf32>
    %464 = arith.addf %389, %463 : vector<2x256xf32>
    %cst_68 = arith.constant 0.000000e+00 : f32
    %465 = vector.broadcast %cst_68 : f32 to vector<2x256xf32>
    %c5 = arith.constant 5 : index
    %466 = memref.load %arg7[%c5] : memref<98xf32, #tpu.memory_space<smem>>
    %467 = vector.extract_strided_slice %85 {offsets = [0, 5], sizes = [2, 256], strides = [1, 1]} : vector<2x384xf32> to vector<2x256xf32>
    %468 = vector.broadcast %466 : f32 to vector<2x256xf32>
    %469 = arith.mulf %468, %467 : vector<2x256xf32>
    %470 = arith.addf %465, %469 : vector<2x256xf32>
    %c12 = arith.constant 12 : index
    %471 = memref.load %arg7[%c12] : memref<98xf32, #tpu.memory_space<smem>>
    %472 = vector.extract_strided_slice %85 {offsets = [0, 21], sizes = [2, 256], strides = [1, 1]} : vector<2x384xf32> to vector<2x256xf32>
    %473 = vector.broadcast %471 : f32 to vector<2x256xf32>
    %474 = arith.mulf %473, %472 : vector<2x256xf32>
    %475 = arith.addf %470, %474 : vector<2x256xf32>
    %c19 = arith.constant 19 : index
    %476 = memref.load %arg7[%c19] : memref<98xf32, #tpu.memory_space<smem>>
    %477 = vector.extract_strided_slice %85 {offsets = [0, 37], sizes = [2, 256], strides = [1, 1]} : vector<2x384xf32> to vector<2x256xf32>
    %478 = vector.broadcast %476 : f32 to vector<2x256xf32>
    %479 = arith.mulf %478, %477 : vector<2x256xf32>
    %480 = arith.addf %475, %479 : vector<2x256xf32>
    %c26 = arith.constant 26 : index
    %481 = memref.load %arg7[%c26] : memref<98xf32, #tpu.memory_space<smem>>
    %482 = vector.extract_strided_slice %85 {offsets = [0, 53], sizes = [2, 256], strides = [1, 1]} : vector<2x384xf32> to vector<2x256xf32>
    %483 = vector.broadcast %481 : f32 to vector<2x256xf32>
    %484 = arith.mulf %483, %482 : vector<2x256xf32>
    %485 = arith.addf %480, %484 : vector<2x256xf32>
    %c33 = arith.constant 33 : index
    %486 = memref.load %arg7[%c33] : memref<98xf32, #tpu.memory_space<smem>>
    %487 = vector.extract_strided_slice %85 {offsets = [0, 69], sizes = [2, 256], strides = [1, 1]} : vector<2x384xf32> to vector<2x256xf32>
    %488 = vector.broadcast %486 : f32 to vector<2x256xf32>
    %489 = arith.mulf %488, %487 : vector<2x256xf32>
    %490 = arith.addf %485, %489 : vector<2x256xf32>
    %c40 = arith.constant 40 : index
    %491 = memref.load %arg7[%c40] : memref<98xf32, #tpu.memory_space<smem>>
    %492 = vector.extract_strided_slice %85 {offsets = [0, 85], sizes = [2, 256], strides = [1, 1]} : vector<2x384xf32> to vector<2x256xf32>
    %493 = vector.broadcast %491 : f32 to vector<2x256xf32>
    %494 = arith.mulf %493, %492 : vector<2x256xf32>
    %495 = arith.addf %490, %494 : vector<2x256xf32>
    %c47 = arith.constant 47 : index
    %496 = memref.load %arg7[%c47] : memref<98xf32, #tpu.memory_space<smem>>
    %497 = vector.extract_strided_slice %85 {offsets = [0, 101], sizes = [2, 256], strides = [1, 1]} : vector<2x384xf32> to vector<2x256xf32>
    %498 = vector.broadcast %496 : f32 to vector<2x256xf32>
    %499 = arith.mulf %498, %497 : vector<2x256xf32>
    %500 = arith.addf %495, %499 : vector<2x256xf32>
    %c54 = arith.constant 54 : index
    %501 = memref.load %arg7[%c54] : memref<98xf32, #tpu.memory_space<smem>>
    %502 = vector.extract_strided_slice %87 {offsets = [0, 5], sizes = [2, 256], strides = [1, 1]} : vector<2x384xf32> to vector<2x256xf32>
    %503 = vector.broadcast %501 : f32 to vector<2x256xf32>
    %504 = arith.mulf %503, %502 : vector<2x256xf32>
    %505 = arith.addf %500, %504 : vector<2x256xf32>
    %c61 = arith.constant 61 : index
    %506 = memref.load %arg7[%c61] : memref<98xf32, #tpu.memory_space<smem>>
    %507 = vector.extract_strided_slice %87 {offsets = [0, 21], sizes = [2, 256], strides = [1, 1]} : vector<2x384xf32> to vector<2x256xf32>
    %508 = vector.broadcast %506 : f32 to vector<2x256xf32>
    %509 = arith.mulf %508, %507 : vector<2x256xf32>
    %510 = arith.addf %505, %509 : vector<2x256xf32>
    %c68 = arith.constant 68 : index
    %511 = memref.load %arg7[%c68] : memref<98xf32, #tpu.memory_space<smem>>
    %512 = vector.extract_strided_slice %87 {offsets = [0, 37], sizes = [2, 256], strides = [1, 1]} : vector<2x384xf32> to vector<2x256xf32>
    %513 = vector.broadcast %511 : f32 to vector<2x256xf32>
    %514 = arith.mulf %513, %512 : vector<2x256xf32>
    %515 = arith.addf %510, %514 : vector<2x256xf32>
    %c75 = arith.constant 75 : index
    %516 = memref.load %arg7[%c75] : memref<98xf32, #tpu.memory_space<smem>>
    %517 = vector.extract_strided_slice %87 {offsets = [0, 53], sizes = [2, 256], strides = [1, 1]} : vector<2x384xf32> to vector<2x256xf32>
    %518 = vector.broadcast %516 : f32 to vector<2x256xf32>
    %519 = arith.mulf %518, %517 : vector<2x256xf32>
    %520 = arith.addf %515, %519 : vector<2x256xf32>
    %c82 = arith.constant 82 : index
    %521 = memref.load %arg7[%c82] : memref<98xf32, #tpu.memory_space<smem>>
    %522 = vector.extract_strided_slice %87 {offsets = [0, 69], sizes = [2, 256], strides = [1, 1]} : vector<2x384xf32> to vector<2x256xf32>
    %523 = vector.broadcast %521 : f32 to vector<2x256xf32>
    %524 = arith.mulf %523, %522 : vector<2x256xf32>
    %525 = arith.addf %520, %524 : vector<2x256xf32>
    %c89 = arith.constant 89 : index
    %526 = memref.load %arg7[%c89] : memref<98xf32, #tpu.memory_space<smem>>
    %527 = vector.extract_strided_slice %87 {offsets = [0, 85], sizes = [2, 256], strides = [1, 1]} : vector<2x384xf32> to vector<2x256xf32>
    %528 = vector.broadcast %526 : f32 to vector<2x256xf32>
    %529 = arith.mulf %528, %527 : vector<2x256xf32>
    %530 = arith.addf %525, %529 : vector<2x256xf32>
    %c96 = arith.constant 96 : index
    %531 = memref.load %arg7[%c96] : memref<98xf32, #tpu.memory_space<smem>>
    %532 = vector.extract_strided_slice %87 {offsets = [0, 101], sizes = [2, 256], strides = [1, 1]} : vector<2x384xf32> to vector<2x256xf32>
    %533 = vector.broadcast %531 : f32 to vector<2x256xf32>
    %534 = arith.mulf %533, %532 : vector<2x256xf32>
    %535 = arith.addf %530, %534 : vector<2x256xf32>
    %536 = vector.extract_strided_slice %88 {offsets = [5, 0], sizes = [1, 256], strides = [1, 1]} : vector<7x256xf32> to vector<1x256xf32>
    %537 = vector.broadcast %536 : vector<1x256xf32> to vector<2x256xf32>
    %538 = arith.mulf %537, %535 : vector<2x256xf32>
    %539 = arith.addf %464, %538 : vector<2x256xf32>
    %cst_69 = arith.constant 0.000000e+00 : f32
    %540 = vector.broadcast %cst_69 : f32 to vector<2x256xf32>
    %c6 = arith.constant 6 : index
    %541 = memref.load %arg7[%c6] : memref<98xf32, #tpu.memory_space<smem>>
    %542 = vector.extract_strided_slice %85 {offsets = [0, 6], sizes = [2, 256], strides = [1, 1]} : vector<2x384xf32> to vector<2x256xf32>
    %543 = vector.broadcast %541 : f32 to vector<2x256xf32>
    %544 = arith.mulf %543, %542 : vector<2x256xf32>
    %545 = arith.addf %540, %544 : vector<2x256xf32>
    %c13 = arith.constant 13 : index
    %546 = memref.load %arg7[%c13] : memref<98xf32, #tpu.memory_space<smem>>
    %547 = vector.extract_strided_slice %85 {offsets = [0, 22], sizes = [2, 256], strides = [1, 1]} : vector<2x384xf32> to vector<2x256xf32>
    %548 = vector.broadcast %546 : f32 to vector<2x256xf32>
    %549 = arith.mulf %548, %547 : vector<2x256xf32>
    %550 = arith.addf %545, %549 : vector<2x256xf32>
    %c20 = arith.constant 20 : index
    %551 = memref.load %arg7[%c20] : memref<98xf32, #tpu.memory_space<smem>>
    %552 = vector.extract_strided_slice %85 {offsets = [0, 38], sizes = [2, 256], strides = [1, 1]} : vector<2x384xf32> to vector<2x256xf32>
    %553 = vector.broadcast %551 : f32 to vector<2x256xf32>
    %554 = arith.mulf %553, %552 : vector<2x256xf32>
    %555 = arith.addf %550, %554 : vector<2x256xf32>
    %c27 = arith.constant 27 : index
    %556 = memref.load %arg7[%c27] : memref<98xf32, #tpu.memory_space<smem>>
    %557 = vector.extract_strided_slice %85 {offsets = [0, 54], sizes = [2, 256], strides = [1, 1]} : vector<2x384xf32> to vector<2x256xf32>
    %558 = vector.broadcast %556 : f32 to vector<2x256xf32>
    %559 = arith.mulf %558, %557 : vector<2x256xf32>
    %560 = arith.addf %555, %559 : vector<2x256xf32>
    %c34 = arith.constant 34 : index
    %561 = memref.load %arg7[%c34] : memref<98xf32, #tpu.memory_space<smem>>
    %562 = vector.extract_strided_slice %85 {offsets = [0, 70], sizes = [2, 256], strides = [1, 1]} : vector<2x384xf32> to vector<2x256xf32>
    %563 = vector.broadcast %561 : f32 to vector<2x256xf32>
    %564 = arith.mulf %563, %562 : vector<2x256xf32>
    %565 = arith.addf %560, %564 : vector<2x256xf32>
    %c41 = arith.constant 41 : index
    %566 = memref.load %arg7[%c41] : memref<98xf32, #tpu.memory_space<smem>>
    %567 = vector.extract_strided_slice %85 {offsets = [0, 86], sizes = [2, 256], strides = [1, 1]} : vector<2x384xf32> to vector<2x256xf32>
    %568 = vector.broadcast %566 : f32 to vector<2x256xf32>
    %569 = arith.mulf %568, %567 : vector<2x256xf32>
    %570 = arith.addf %565, %569 : vector<2x256xf32>
    %c48 = arith.constant 48 : index
    %571 = memref.load %arg7[%c48] : memref<98xf32, #tpu.memory_space<smem>>
    %572 = vector.extract_strided_slice %85 {offsets = [0, 102], sizes = [2, 256], strides = [1, 1]} : vector<2x384xf32> to vector<2x256xf32>
    %573 = vector.broadcast %571 : f32 to vector<2x256xf32>
    %574 = arith.mulf %573, %572 : vector<2x256xf32>
    %575 = arith.addf %570, %574 : vector<2x256xf32>
    %c55 = arith.constant 55 : index
    %576 = memref.load %arg7[%c55] : memref<98xf32, #tpu.memory_space<smem>>
    %577 = vector.extract_strided_slice %87 {offsets = [0, 6], sizes = [2, 256], strides = [1, 1]} : vector<2x384xf32> to vector<2x256xf32>
    %578 = vector.broadcast %576 : f32 to vector<2x256xf32>
    %579 = arith.mulf %578, %577 : vector<2x256xf32>
    %580 = arith.addf %575, %579 : vector<2x256xf32>
    %c62 = arith.constant 62 : index
    %581 = memref.load %arg7[%c62] : memref<98xf32, #tpu.memory_space<smem>>
    %582 = vector.extract_strided_slice %87 {offsets = [0, 22], sizes = [2, 256], strides = [1, 1]} : vector<2x384xf32> to vector<2x256xf32>
    %583 = vector.broadcast %581 : f32 to vector<2x256xf32>
    %584 = arith.mulf %583, %582 : vector<2x256xf32>
    %585 = arith.addf %580, %584 : vector<2x256xf32>
    %c69 = arith.constant 69 : index
    %586 = memref.load %arg7[%c69] : memref<98xf32, #tpu.memory_space<smem>>
    %587 = vector.extract_strided_slice %87 {offsets = [0, 38], sizes = [2, 256], strides = [1, 1]} : vector<2x384xf32> to vector<2x256xf32>
    %588 = vector.broadcast %586 : f32 to vector<2x256xf32>
    %589 = arith.mulf %588, %587 : vector<2x256xf32>
    %590 = arith.addf %585, %589 : vector<2x256xf32>
    %c76 = arith.constant 76 : index
    %591 = memref.load %arg7[%c76] : memref<98xf32, #tpu.memory_space<smem>>
    %592 = vector.extract_strided_slice %87 {offsets = [0, 54], sizes = [2, 256], strides = [1, 1]} : vector<2x384xf32> to vector<2x256xf32>
    %593 = vector.broadcast %591 : f32 to vector<2x256xf32>
    %594 = arith.mulf %593, %592 : vector<2x256xf32>
    %595 = arith.addf %590, %594 : vector<2x256xf32>
    %c83 = arith.constant 83 : index
    %596 = memref.load %arg7[%c83] : memref<98xf32, #tpu.memory_space<smem>>
    %597 = vector.extract_strided_slice %87 {offsets = [0, 70], sizes = [2, 256], strides = [1, 1]} : vector<2x384xf32> to vector<2x256xf32>
    %598 = vector.broadcast %596 : f32 to vector<2x256xf32>
    %599 = arith.mulf %598, %597 : vector<2x256xf32>
    %600 = arith.addf %595, %599 : vector<2x256xf32>
    %c90 = arith.constant 90 : index
    %601 = memref.load %arg7[%c90] : memref<98xf32, #tpu.memory_space<smem>>
    %602 = vector.extract_strided_slice %87 {offsets = [0, 86], sizes = [2, 256], strides = [1, 1]} : vector<2x384xf32> to vector<2x256xf32>
    %603 = vector.broadcast %601 : f32 to vector<2x256xf32>
    %604 = arith.mulf %603, %602 : vector<2x256xf32>
    %605 = arith.addf %600, %604 : vector<2x256xf32>
    %c97 = arith.constant 97 : index
    %606 = memref.load %arg7[%c97] : memref<98xf32, #tpu.memory_space<smem>>
    %607 = vector.extract_strided_slice %87 {offsets = [0, 102], sizes = [2, 256], strides = [1, 1]} : vector<2x384xf32> to vector<2x256xf32>
    %608 = vector.broadcast %606 : f32 to vector<2x256xf32>
    %609 = arith.mulf %608, %607 : vector<2x256xf32>
    %610 = arith.addf %605, %609 : vector<2x256xf32>
    %611 = vector.extract_strided_slice %88 {offsets = [6, 0], sizes = [1, 256], strides = [1, 1]} : vector<7x256xf32> to vector<1x256xf32>
    %612 = vector.broadcast %611 : vector<1x256xf32> to vector<2x256xf32>
    %613 = arith.mulf %612, %610 : vector<2x256xf32>
    %614 = arith.addf %539, %613 : vector<2x256xf32>
    %615 = arith.negf %614 : vector<2x256xf32>
    %616 = math.exp %615 : vector<2x256xf32>
    %cst_70 = arith.constant 1.000000e+00 : f32
    %617 = vector.broadcast %cst_70 : f32 to vector<2x256xf32>
    %618 = arith.addf %617, %616 : vector<2x256xf32>
    %619 = arith.divf %617, %618 : vector<2x256xf32>
    %620 = vector.extract_strided_slice %619 {offsets = [0, 0], sizes = [1, 256], strides = [1, 1]} : vector<2x256xf32> to vector<1x256xf32>
    %621 = vector.broadcast %620 : vector<1x256xf32> to vector<8x256xf32>
    %622 = arith.mulf %54, %621 : vector<8x256xf32>
    %623 = vector.extract_strided_slice %0 {offsets = [0, 0, 0], sizes = [1, 8, 256], strides = [1, 1, 1]} : vector<2x8x256xf32> to vector<1x8x256xf32>
    %624 = vector.shape_cast %623 : vector<1x8x256xf32> to vector<8x256xf32>
    %625 = arith.addf %622, %624 : vector<8x256xf32>
    %c0_71 = arith.constant 0 : index
    %c0_72 = arith.constant 0 : index
    %c0_73 = arith.constant 0 : index
    %626 = vector.load %arg8[%c0_71, %c0_72, %c0_73] : memref<2x8x256xf32, #tpu.memory_space<vmem>>, vector<1x8x256xf32>
    %627 = vector.shape_cast %626 : vector<1x8x256xf32> to vector<8x256xf32>
    %628 = vector.shape_cast %625 : vector<8x256xf32> to vector<1x8x256xf32>
    tpu.vector_store %arg8[%c0_71, %c0_72, %c0_73], %628 {strides = array<i32>} : memref<2x8x256xf32, #tpu.memory_space<vmem>>, vector<1x8x256xf32>,
    %629 = vector.extract_strided_slice %619 {offsets = [1, 0], sizes = [1, 256], strides = [1, 1]} : vector<2x256xf32> to vector<1x256xf32>
    %630 = vector.broadcast %629 : vector<1x256xf32> to vector<8x256xf32>
    %631 = arith.mulf %71, %630 : vector<8x256xf32>
    %632 = vector.extract_strided_slice %0 {offsets = [1, 0, 0], sizes = [1, 8, 256], strides = [1, 1, 1]} : vector<2x8x256xf32> to vector<1x8x256xf32>
    %633 = vector.shape_cast %632 : vector<1x8x256xf32> to vector<8x256xf32>
    %634 = arith.addf %631, %633 : vector<8x256xf32>
    %c1_74 = arith.constant 1 : index
    %c0_75 = arith.constant 0 : index
    %c0_76 = arith.constant 0 : index
    %635 = vector.load %arg8[%c1_74, %c0_75, %c0_76] : memref<2x8x256xf32, #tpu.memory_space<vmem>>, vector<1x8x256xf32>
    %636 = vector.shape_cast %635 : vector<1x8x256xf32> to vector<8x256xf32>
    %637 = vector.shape_cast %634 : vector<8x256xf32> to vector<1x8x256xf32>
    tpu.vector_store %arg8[%c1_74, %c0_75, %c0_76], %637 {strides = array<i32>} : memref<2x8x256xf32, #tpu.memory_space<vmem>>, vector<1x8x256xf32>,
    return
  }
  func.func @transform_0(%arg0: i32) -> (i32, i32, i32) {
    %c0_i32 = arith.constant 0 : i32
    %c0_i32_0 = arith.constant 0 : i32
    %c0_i32_1 = arith.constant 0 : i32
    return %arg0, %c0_i32, %c0_i32_0 : i32, i32, i32
  }
  func.func @transform_1(%arg0: i32) -> (i32, i32) {
    %c0_i32 = arith.constant 0 : i32
    %c0_i32_0 = arith.constant 0 : i32
    %c0_i32_1 = arith.constant 0 : i32
    return %c0_i32, %c0_i32_0 : i32, i32
  }
  func.func @transform_2(%arg0: i32) -> (i32, i32) {
    %c0_i32 = arith.constant 0 : i32
    %c0_i32_0 = arith.constant 0 : i32
    %c0_i32_1 = arith.constant 0 : i32
    return %c0_i32, %c0_i32_0 : i32, i32
  }
  func.func @transform_3(%arg0: i32) -> (i32, i32) {
    %c0_i32 = arith.constant 0 : i32
    %c0_i32_0 = arith.constant 0 : i32
    %c0_i32_1 = arith.constant 0 : i32
    return %c0_i32, %c0_i32_0 : i32, i32
  }
  func.func @transform_4(%arg0: i32) -> (i32, i32) {
    %c0_i32 = arith.constant 0 : i32
    %c0_i32_0 = arith.constant 0 : i32
    %c0_i32_1 = arith.constant 0 : i32
    return %c0_i32, %c0_i32_0 : i32, i32
  }
  func.func @transform_5(%arg0: i32) -> (i32, i32) {
    %c0_i32 = arith.constant 0 : i32
    %c0_i32_0 = arith.constant 0 : i32
    %c0_i32_1 = arith.constant 0 : i32
    return %c0_i32, %c0_i32_0 : i32, i32
  }
  func.func @transform_6(%arg0: i32) -> i32 {
    %c0_i32 = arith.constant 0 : i32
    %c0_i32_0 = arith.constant 0 : i32
    return %c0_i32 : i32
  }
  func.func @transform_7(%arg0: i32) -> (i32, i32, i32) {
    %c0_i32 = arith.constant 0 : i32
    %c0_i32_0 = arith.constant 0 : i32
    %c0_i32_1 = arith.constant 0 : i32
    return %arg0, %c0_i32, %c0_i32_0 : i32, i32, i32
  }
}

</mosaic_0001>

<bundles_post_ra>
// kernel: tpu_custom_call.1
= control target key start
LH: loop header
LB: loop body
LE: loop exit
PB: predicated region body
PF: predicated region fallthrough
CT: control target
= control target key end

     0   :  { %12 = vsyncpa [#allocation5], 0  ;;  %s2597_s0 = inlined_call_operand.hbm [shape: f32[2,8,256], index: 0, kind: input, shape index: {}]   ;;  %s2598_s1 = inlined_call_operand.vmem [shape: f32[4,8], index: 1, kind: input, shape index: {}]   ;;  %s2599_s2 = inlined_call_operand.vmem [shape: f32[4,1], index: 2, kind: input, shape index: {}]   ;;  %s2600_s3 = inlined_call_operand.vmem [shape: f32[8,4], index: 3, kind: input, shape index: {}]   ;;  %s2601_s4 = inlined_call_operand.vmem [shape: f32[8,1], index: 4, kind: input, shape index: {}]   ;;  %s2602_s5 = inlined_call_operand.vmem [shape: f32[7,256], index: 5, kind: input, shape index: {}]   ;;  %s2603_s6 = inlined_call_operand.vmem [shape: f32[98], index: 6, kind: input, shape index: {}]   ;;  %s2604_s7 = inlined_call_operand.hbm [shape: f32[2,8,256], index: 7, kind: output, shape index: {}]  }
   0x1   :  { %13 = vsyncpa [#allocation7], 0 }
   0x2   :  { %14 = vsyncpa [#allocation6], 0  ;;  %s1888_s24 = smov [#allocation4]   ;;  %s43_s28 = sshll.u32 %s2603_s6, 4  ;;  %s44_s28 = int_to_ptr.vmem [resolvable:$true] %s43_s28 }
   0x3   :  { %s20_s25 = sshll.u32 %s1888_s24, 4  ;;  %s1826_s8 = scalar_lea.hbm %s2597_s0, 512  ;;  %s21_s25 = int_to_ptr.vmem [resolvable:$true] %s20_s25 }
   0x4   :  { %p1827_p0 = scmp.ne.s32.totalorder %s2597_s0, %s1826_s8  ;;  %p1830_p1 = scmp.lt.u32.totalorder %s1826_s8, %s2597_s0 }
   0x6   :  { %p1832_p2 = pnand %p1830_p1, %p1827_p0 }
   0x8   :  { %1835 = shalt.err (!%p1832_p2)
}
   0x9   :  { %s1836_s13 = scalar_lea.vmem %s21_s25, 512  ;;  %p1841_p4 = scmp.lt.s32.totalorder %s21_s25, %s21_s25 }
   0xa   :  { %p1837_p3 = scmp.ne.s32.totalorder %s21_s25, %s1836_s13  ;;  %p1842_p5 = scmp.lt.s32.totalorder %s1836_s13, %s1836_s13 }
   0xc   :  { %p1843_p6 = por %p1842_p5, %p1841_p4 }
   0xe   :  { %p1844_p7 = pnand %p1843_p6, %p1837_p3 }
  0x10   :  { %1847 = shalt.err (!%p1844_p7)
}
  0x11   :  { %s1889_s6 = smov 256   ;;  %s1890_s14 = smov 16  }
  0x12   :  { %26 = dma.hbm_to_vmem [thread:$0]  %s2597_s0, 512, %s21_s25, [#allocation5], %s1889_s6, %s1889_s6, %s1890_s14  }
  0x13   :  { %s1848_s17 = scalar_lea.vmem %s44_s28, 16  ;;  %p1853_p9 = scmp.lt.s32.totalorder %s44_s28, %s44_s28 }
  0x14   :  { %p1849_p8 = scmp.ne.s32.totalorder %s44_s28, %s1848_s17  ;;  %p1854_p10 = scmp.lt.s32.totalorder %s1848_s17, %s1848_s17 }
  0x16   :  { %p1855_p11 = por %p1854_p10, %p1853_p9 }
  0x18   :  { %p1856_p12 = pnand %p1855_p11, %p1849_p8 }
  0x1a   :  { %1859 = shalt.err (!%p1856_p12)
}
  0x1b   :  { %s1891_s18 = smov [#allocation8]  }
  0x1c   :  { %46 = dma.vmem_to_smem %s44_s28, 16, %s1891_s18, [#allocation7]  }
  0x1d   :  { %1882 = dma.done.wait [#allocation5], 512  }
  0x1e   :  { %1883 = vsyncadd [#allocation5], 4294966784 }
  0x1f   :  { %1884 = dma.done.wait [#allocation7], 16  }
  0x20   :  { %1885 = vsyncadd [#allocation7], 4294967280 }
  0x21   :  { %53 = sfence }
  0x22   :  { %v1970_v0 = vld [vmem:[#allocation4] sm:$0xff]  ;;  %v1972_v1 = vld [vmem:[#allocation4 + $0x8] sm:$0xff]  ;;  %v1974_v2 = vld [vmem:[#allocation4 + $0x10] sm:$0xff]  ;;  %v1892_v8 = vmov 0.0   ;;  %vm1893_vm0 = vmmov 0   ;;  %v1894_v10 = vmov 0   ;;  %v292_v44 = vlaneseq }
  0x23   :  { %v63_v3 = vadd.f32 %v1972_v1, %v1970_v0  ;;  %v1978_v4 = vld [vmem:[#allocation4 + $0x18] sm:$0xff]  ;;  %v58_v6 = vmax.f32 %v1970_v0, %v1972_v1  ;;  %1768 = vmatprep.subr.mxu0 %v1892_v8  ;;  %265 = vst [vmem:[#allocation2] sm:$0x3f] %v1892_v8  ;;  %266 = vst [vmem:[#allocation2 + $0x6] sm:$0x3f] %v1892_v8  ;;  %1773 = vmatprep.subr.mxu1 %v1892_v8  ;;  %vm61_vm1 = vcmask 7168  }
  0x24   :  { %v75_v5 = vadd.f32 %v1978_v4, %v1974_v2  ;;  %v70_v7 = vmax.f32 %v1974_v2, %v1978_v4  ;;  %1770 = vmatprep.mubr.msk.f32.mxu0 %vm1893_vm0, %v1892_v8  ;;  %1775 = vmatprep.mubr.msk.f32.mxu1 %vm1893_vm0, %v1892_v8  ;;  %v83_v9 = vld [vmem:[%s2599_s2] sm:$0xf]  ;;  %vm68_vm2 = vcmask 23568   ;;  %vm73_vm3 = vcmask 15368   ;;  %s1666_s24 = sld [smem:[#allocation8 + $0xe]]  ;;  %s1665_s25 = sld [smem:[#allocation8 + $0x7]] }
  0x25   :  { %64 = vadd.xlane.f32.xlu0 %v63_v3  ;;  %1803 = vset.pattern.permute.xlu1 %v1894_v10  ;;  %vm79_vm4 = vcmask 31768   ;;  %v82_v17 = vld [vmem:[%s2598_s1] sm:$0xf]  ;;  %vm89_vm5 = vcmask 64512   ;;  %vm180_vm6 = vcmask 1043456   ;;  %vm176_vm7 = vcmask 31744  }
  0x26   :  { %76 = vadd.xlane.f32.xlu1 %v75_v5  ;;  %1802 = vset.pattern.permute.xlu0 %v1894_v10  ;;  %v170_v19 = vld [vmem:[%s2601_s4] sm:$0xff]  ;;  %s1895_s4 = smov 126   ;;  %v1896_v34 = vmov 1   ;;  %v1897_v42 = vmov 1966171168   ;;  %v2008_v50 = vshrl.u32 %v292_v44, 7 }
  0x27   :  { %v169_v29 = vld [vmem:[%s2600_s3] sm:$0xff]  ;;  %v290_v43 = vunpack.c.l.s4 %v1897_v42  ;;  %s1898_s3 = smov 51   ;;  %vm310_vm8 = vcmp.ge.s32.totalorder %v292_v44, 51  ;;  %vm311_vm9 = vcmp.lt.s32.totalorder %v292_v44, 307  ;;  %vm306_vm10 = vcmask 416768   ;;  %s1668_s26 = sld [smem:[#allocation8 + $0x1c]] }
  0x28   :  { %vm2029_vm11 = vmand %vm310_vm8, %vm311_vm9  ;;  %s1667_s27 = sld [smem:[#allocation8 + $0x15]]  ;;  %s1680_s28 = sld [smem:[#allocation8 + $0xf]]  ;;  %vm447_vm12 = vcmask 916480   ;;  %vm458_vm13 = vcmask 785408   ;;  %vm469_vm14 = vcmask 654336   ;;  %vm480_vm15 = vcmask 523264  }
  0x29   :  { %59 = vmax.xlane.f32.xlu0 %v58_v6  ;;  %v291_v49 = vunpack.c.0.s8 %v290_v43  ;;  %s1679_s29 = sld [smem:[#allocation8 + $0x8]]  ;;  %s1681_s30 = sld [smem:[#allocation8 + $0x16]]  ;;  %vm491_vm0 = vcmask 392192  }
  0x2a   :  { %71 = vmax.xlane.f32.xlu1 %v70_v7  ;;  %s1693_s8 = sld [smem:[#allocation8 + $0x9]]  ;;  %s1899_s9 = smov 96  }
  0x2b   :  { %s1900_s10 = smov 112   ;;  %s1707_s11 = sld [smem:[#allocation8 + $0xa]] }
  0x2c   :  { %s1694_s12 = sld [smem:[#allocation8 + $0x10]]  ;;  %s1901_s13 = smov 64  }
  0x2d   :  { %s1902_s15 = smov 80   ;;  %s1695_s16 = sld [smem:[#allocation8 + $0x17]] }
  0x2e   :  { %s1682_s17 = sld [smem:[#allocation8 + $0x1d]]  ;;  %s1721_s18 = sld [smem:[#allocation8 + $0xb]] }
  0x2f   :  { %s1708_s0 = sld [smem:[#allocation8 + $0x11]]  ;;  %s1696_s19 = sld [smem:[#allocation8 + $0x1e]] }
  0x30   :  { %s1683_s20 = sld [smem:[#allocation8 + $0x24]]  ;;  %s1722_s2 = sld [smem:[#allocation8 + $0x12]] }
  0x31   :  { %s1709_s21 = sld [smem:[#allocation8 + $0x18]]  ;;  %s1684_s22 = sld [smem:[#allocation8 + $0x2b]] }
  0x32   :  { %s1735_s1 = sld [smem:[#allocation8 + $0xc]]  ;;  %s1710_s23 = sld [smem:[#allocation8 + $0x1f]] }
  0x3b   :  { %173 = vperm.xlu1 %1803, %v170_v19  }
  0x3f   :  { %86 = vperm.xlu0 %1802, %v83_v9  }
  0x43   :  { %1805 = vset.pattern.permute.xlu0 %v1896_v34 }
  0xb2   :  { %v65_v11 = vpop.xlane.xlu0 %64 }
  0xb3   :  { %v77_v12 = vpop.xlane.xlu1 %76  ;;  %v67_v13 = vmul.f32 0.00390625, %v65_v11 }
  0xb4   :  { %v78_v16 = vmul.f32 0.00390625, %v77_v12 }
  0xb6   :  { %v60_v14 = vpop.xlane.xlu0 %59 }
  0xb7   :  { %62 = vst.msk [vmem:[#allocation3] sm:$0xff] %vm61_vm1, %v60_v14  ;;  %v72_v15 = vpop.xlane.xlu1 %71  ;;  %vm502_vm1 = vcmask 261120  }
  0xb8   :  { %69 = vst.msk [vmem:[#allocation3] sm:$0xff] %vm68_vm2, %v67_v13  ;;  %vm752_vm2 = vcmask 1039360  }
  0xb9   :  { %74 = vst.msk [vmem:[#allocation3] sm:$0xff] %vm73_vm3, %v72_v15  ;;  %vm920_vm3 = vcmask 1031168  }
  0xba   :  { %80 = vst.msk [vmem:[#allocation3] sm:$0xff] %vm79_vm4, %v78_v16  ;;  %vm1088_vm4 = vcmask 1022976  }
  0xbb   :  { %v174_v30 = vpop.permute.xlu1 %173 }
  0xbe   :  { %v87_v20 = vpop.permute.xlu0 %86 }
  0xc1   :  { %v81_v18 = vld [vmem:[#allocation3] sm:$0xff] }
  0xc2   :  { %1769 = vmatpush3.msra.mxu0 %v81_v18 }
  0xc3   :  { %1771 = vmatmul.mubr.msk.f32.vlgmr.msra.gmra.mrb[0].mxu0 %vm89_vm5, %v82_v17  ;;  %vm1256_vm5 = vcmask 1014784  }
 0x196   :  { %v159_v21 = vpop.f32.mrb[0].mxu0 }
 0x197   :  { %v160_v22 = vadd.f32 %v159_v21, %v87_v20  ;;  %v1772_v23 = vpop.f32.mrb[1].mxu0 }
 0x199   :  { %v165_v24 = vmul.f32 0.70710677, %v160_v22  ;;  %v163_v26 = vmul.f32 0.5, %v160_v22 }
 0x19b   :  { %1806 = verf.f32 %v165_v24 }
 0x1a5   :  { %v1807_v25 = vpop.eup %1806 }
 0x1a6   :  { %v167_v27 = vadd.f32 1.0, %v1807_v25 }
 0x1a8   :  { %v168_v28 = vmul.f32 %v167_v27, %v163_v26 }
 0x1aa   :  { %1774 = vmatpush3.msk.msra.mxu1 %vm180_vm6, %v168_v28  ;;  %vm1592_vm6 = vcmask 998400  }
 0x1ab   :  { %1776 = vmatmul.mubr.msk.f32.vlgmr.msra.gmra.mrb[0].mxu1 %vm176_vm7, %v169_v29  ;;  %vm1424_vm7 = vcmask 1006592  }
 0x27e   :  { %v250_v31 = vpop.f32.mrb[0].mxu1 }
 0x27f   :  { %v251_v32 = vadd.f32 %v250_v31, %v174_v30  ;;  %v1777_v33 = vpop.f32.mrb[1].mxu1 }
 0x281   :  { %255 = vrot.lane.b32.xlu1 %v251_v32, %s1895_s4 }
 0x2f3   :  { %v256_v35 = vpop.permute.xlu1 %255 }
 0x2f4   :  { %v258_v36 = vadd.f32 %v256_v35, %v251_v32 }
 0x2f6   :  { %v1664_v37 = vmul.f32 -1.442695, %v258_v36 }
 0x2f8   :  { %1808 = vpow2.f32 %v1664_v37 }
 0x302   :  { %v1809_v38 = vpop.eup %1808 }
 0x303   :  { %v262_v39 = vadd.f32 1.0, %v1809_v38 }
 0x305   :  { %1810 = vrcp.f32 %v262_v39 }
 0x30f   :  { %v1811_v40 = vpop.eup %1810 }
 0x310   :  { %269 = vperm.xlu1 %1803, %v1811_v40  }
 0x314   :  { %1804 = vset.pattern.permute.xlu1 %v1896_v34 }
 0x315   :  { %353 = vperm.xlu1 %1804, %v1811_v40  }
 0x38f   :  { %v270_v41 = vpop.permute.xlu1 %269 }
 0x390   :  { %v2000_v45 = vmul.f32 %v270_v41, %v1970_v0  ;;  %v2003_v46 = vmul.f32 %v270_v41, %v1972_v1  ;;  %v294_v0 = vsub.s32 %v291_v49, %v2008_v50 }
 0x392   :  { %v274_v47 = vrot.slane %v2000_v45, 4  ;;  %v280_v48 = vrot.slane %v2003_v46, 4 }
 0x394   :  { %v275_v51 = vmax.f32 %v2000_v45, %v274_v47  ;;  %v281_v52 = vmax.f32 %v2003_v46, %v280_v48  ;;  %v315_v53 = vadd.f32 %v274_v47, %v2000_v45  ;;  %v321_v54 = vadd.f32 %v280_v48, %v2003_v46  ;;  %v354_v55 = vpop.permute.xlu1 %353 }
 0x395   :  { %v2015_v56 = vmul.f32 %v354_v55, %v1974_v2  ;;  %v2018_v57 = vmul.f32 %v354_v55, %v1978_v4 }
 0x396   :  { %v276_v58 = vrot.slane %v275_v51, 2  ;;  %v282_v59 = vrot.slane %v281_v52, 2  ;;  %v316_v60 = vrot.slane %v315_v53, 2  ;;  %v322_v61 = vrot.slane %v321_v54, 2 }
 0x397   :  { %v358_v62 = vrot.slane %v2015_v56, 4  ;;  %v364_v63 = vrot.slane %v2018_v57, 4 }
 0x398   :  { %v277_v1 = vmax.f32 %v275_v51, %v276_v58  ;;  %v283_v3 = vmax.f32 %v281_v52, %v282_v59  ;;  %v317_v5 = vadd.f32 %v316_v60, %v315_v53  ;;  %v323_v6 = vadd.f32 %v322_v61, %v321_v54 }
 0x399   :  { %v359_v2 = vmax.f32 %v2015_v56, %v358_v62  ;;  %v365_v7 = vmax.f32 %v2018_v57, %v364_v63  ;;  %v395_v4 = vadd.f32 %v358_v62, %v2015_v56  ;;  %v401_v8 = vadd.f32 %v364_v63, %v2018_v57 }
 0x39a   :  { %v278_v9 = vrot.slane %v277_v1, 1  ;;  %v284_v10 = vrot.slane %v283_v3, 1  ;;  %v318_v11 = vrot.slane %v317_v5, 1  ;;  %v324_v12 = vrot.slane %v323_v6, 1 }
 0x39b   :  { %v360_v13 = vrot.slane %v359_v2, 2  ;;  %v366_v14 = vrot.slane %v365_v7, 2  ;;  %v396_v15 = vrot.slane %v395_v4, 2  ;;  %v402_v16 = vrot.slane %v401_v8, 2 }
 0x39c   :  { %v279_v17 = vmax.f32 %v277_v1, %v278_v9  ;;  %v285_v18 = vmax.f32 %v283_v3, %v284_v10  ;;  %v319_v19 = vadd.f32 %v318_v11, %v317_v5  ;;  %v325_v20 = vadd.f32 %v324_v12, %v323_v6 }
 0x39d   :  { %v361_v21 = vmax.f32 %v359_v2, %v360_v13  ;;  %v367_v22 = vmax.f32 %v365_v7, %v366_v14  ;;  %v397_v23 = vadd.f32 %v396_v15, %v395_v4  ;;  %v403_v24 = vadd.f32 %v402_v16, %v401_v8 }
 0x39e   :  { %v288_v25 = vcombine.low %v279_v17, %v285_v18  ;;  %v326_v26 = vmul.f32 0.125, %v319_v19  ;;  %v327_v27 = vmul.f32 0.125, %v325_v20  ;;  %v452_v3 = vstv %s1666_s24  ;;  %s1903_s24 = smov 48  }
 0x39f   :  { %v362_v28 = vrot.slane %v361_v21, 1  ;;  %v368_v29 = vrot.slane %v367_v22, 1  ;;  %v398_v30 = vrot.slane %v397_v23, 1  ;;  %v404_v31 = vrot.slane %v403_v24, 1 }
 0x3a0   :  { %v295_v32 = vrot.slane %v288_v25, %v294_v0  ;;  %v330_v39 = vcombine.low %v326_v26, %v327_v27  ;;  %v441_v5 = vstv %s1665_s25  ;;  %v474_v8 = vstv %s1668_s26  ;;  %s1736_s25 = sld [smem:[#allocation8 + $0x13]]  ;;  %s1723_s26 = sld [smem:[#allocation8 + $0x19]] }
 0x3a1   :  { %v363_v33 = vmax.f32 %v361_v21, %v362_v28  ;;  %v369_v34 = vmax.f32 %v367_v22, %v368_v29  ;;  %v399_v35 = vadd.f32 %v398_v30, %v397_v23  ;;  %v405_v36 = vadd.f32 %v404_v31, %v403_v24 }
 0x3a2   :  { %v302_v37 = vrot.slane %v295_v32, %v294_v0  ;;  %v337_v47 = vrot.slane %v330_v39, %v294_v0  ;;  %v463_v9 = vstv %s1667_s27  ;;  %v608_v12 = vstv %s1680_s28  ;;  %s1698_s27 = sld [smem:[#allocation8 + $0x2c]]  ;;  %s1749_s28 = sld [smem:[#allocation8 + $0xd]] }
 0x3a3   :  { %v372_v38 = vcombine.low %v363_v33, %v369_v34  ;;  %v406_v40 = vmul.f32 0.125, %v399_v35  ;;  %v407_v41 = vmul.f32 0.125, %v405_v36  ;;  %v598_v13 = vstv %s1679_s29  ;;  %s1904_s29 = smov 32  }
 0x3a4   :  { %303 = vrot.lane.b32.xlu1 %v302_v37, %s1898_s3  ;;  %v344_v49 = vrot.slane %v337_v47, %v294_v0  ;;  %v618_v16 = vstv %s1681_s30  ;;  %v766_v17 = vstv %s1693_s8  ;;  %v934_v20 = vstv %s1707_s11  ;;  %s1724_s30 = sld [smem:[#allocation8 + $0x20]]  ;;  %s1711_s8 = sld [smem:[#allocation8 + $0x26]] }
 0x3a5   :  { %v379_v42 = vrot.slane %v372_v38, %v294_v0  ;;  %v410_v48 = vcombine.low %v406_v40, %v407_v41  ;;  %v776_v21 = vstv %s1694_s12  ;;  %v786_v24 = vstv %s1695_s16  ;;  %s1750_s11 = sld [smem:[#allocation8 + $0x14]]  ;;  %s1737_s12 = sld [smem:[#allocation8 + $0x1a]] }
 0x3a6   :  { %v628_v25 = vstv %s1682_s17  ;;  %v1102_v28 = vstv %s1721_s18  ;;  %v944_v29 = vstv %s1708_s0  ;;  %v796_v32 = vstv %s1696_s19  ;;  %s1712_s16 = sld [smem:[#allocation8 + $0x2d]]  ;;  %s1725_s17 = sld [smem:[#allocation8 + $0x27]] }
 0x3a7   :  { %v386_v43 = vrot.slane %v379_v42, %v294_v0  ;;  %v417_v51 = vrot.slane %v410_v48, %v294_v0  ;;  %v638_v33 = vstv %s1683_s20  ;;  %v1112_v36 = vstv %s1722_s2  ;;  %s1738_s18 = sld [smem:[#allocation8 + $0x21]]  ;;  %s1751_s0 = sld [smem:[#allocation8 + $0x1b]] }
 0x3a8   :  { %v954_v37 = vstv %s1709_s21  ;;  %v648_v40 = vstv %s1684_s22  ;;  %v1270_v41 = vstv %s1735_s1  ;;  %v964_v47 = vstv %s1710_s23  ;;  %s1726_s19 = sld [smem:[#allocation8 + $0x2e]]  ;;  %s1739_s20 = sld [smem:[#allocation8 + $0x28]] }
 0x3a9   :  { %387 = vrot.lane.b32.xlu1 %v386_v43, %s1898_s3  ;;  %v424_v52 = vrot.slane %v417_v51, %v294_v0  ;;  %s1752_s2 = sld [smem:[#allocation8 + $0x22]]  ;;  %s1753_s21 = sld [smem:[#allocation8 + $0x29]] }
 0x3aa   :  { %s1740_s22 = sld [smem:[#allocation8 + $0x2f]]  ;;  %s1686_s1 = sld [smem:[#allocation8 + $0x39]] }
 0x3ab   :  { %s1754_s23 = sld [smem:[#allocation8 + $0x30]] }
 0x3ad   :  { %345 = vrot.lane.b32.xlu1 %v344_v49, %s1898_s3 }
 0x3b1   :  { %425 = vrot.lane.b32.xlu1 %v424_v52, %s1898_s3  ;;  %s1697_s3 = sld [smem:[#allocation8 + $0x25]]  ;;  %v1280_v52 = vstv %s1736_s25  ;;  %s1687_s25 = sld [smem:[#allocation8 + $0x40]] }
 0x3b7   :  { %v806_v48 = vstv %s1697_s3  ;;  %s1700_s3 = sld [smem:[#allocation8 + $0x3a]] }
 0x416   :  { %v304_v53 = vpop.permute.xlu1 %303 }
 0x417   :  { %v305_v55 = vrot.slane %v304_v53, 7 }
 0x419   :  { %v307_v58 = vsel %vm306_vm10, %v305_v55, %v304_v53  ;;  %v1122_v53 = vstv %s1723_s26  ;;  %s1688_s26 = sld [smem:[#allocation8 + $0x47]] }
 0x41a   :  { %313 = vst.msk [vmem:[#allocation2] ss:$2 sm:$0x7] %vm2029_vm11, %v307_v58  ;;  %v816_v58 = vstv %s1698_s27  ;;  %s1701_s27 = sld [smem:[#allocation8 + $0x41]] }
 0x41b   :  { %v388_v59 = vpop.permute.xlu1 %387 }
 0x41c   :  { %v389_v60 = vrot.slane %v388_v59, 7 }
 0x41e   :  { %v390_v61 = vsel %vm306_vm10, %v389_v60, %v388_v59  ;;  %v1438_v59 = vstv %s1749_s28  ;;  %s1714_s28 = sld [smem:[#allocation8 + $0x3b]] }
 0x41f   :  { %393 = vst.msk [vmem:[#allocation2 + $0x1] ss:$2 sm:$0x7] %vm2029_vm11, %v390_v61  ;;  %v346_v44 = vpop.permute.xlu1 %345 }
 0x420   :  { %v347_v62 = vrot.slane %v346_v44, 7 }
 0x422   :  { %v348_v63 = vsel %vm306_vm10, %v347_v62, %v346_v44  ;;  %v1132_v44 = vstv %s1724_s30  ;;  %v974_v62 = vstv %s1711_s8  ;;  %s1689_s30 = sld [smem:[#allocation8 + $0x4e]]  ;;  %s1702_s8 = sld [smem:[#allocation8 + $0x48]] }
 0x423   :  { %351 = vst.msk [vmem:[#allocation2 + $0x6] ss:$2 sm:$0x7] %vm2029_vm11, %v348_v63  ;;  %v426_v0 = vpop.permute.xlu1 %425 }
 0x424   :  { %v427_v1 = vrot.slane %v426_v0, 7 }
 0x426   :  { %v2042_v6 = vld [vmem:[#allocation2] sm:$0x3f]  ;;  %v428_v2 = vsel %vm306_vm10, %v427_v1, %v426_v0  ;;  %v1448_v1 = vstv %s1750_s11  ;;  %s1715_s11 = sld [smem:[#allocation8 + $0x42]] }
 0x427   :  { %431 = vst.msk [vmem:[#allocation2 + $0x7] ss:$2 sm:$0x7] %vm2029_vm11, %v428_v2  ;;  %v453_v7 = vmul.f32 %v452_v3, %v2042_v6  ;;  %v442_v4 = vmul.f32 %v441_v5, %v2042_v6  ;;  %v475_v10 = vmul.f32 %v474_v8, %v2042_v6  ;;  %v464_v11 = vmul.f32 %v463_v9, %v2042_v6 }
 0x428   :  { %v609_v14 = vmul.f32 %v608_v12, %v2042_v6  ;;  %v599_v15 = vmul.f32 %v598_v13, %v2042_v6  ;;  %v619_v18 = vmul.f32 %v618_v16, %v2042_v6  ;;  %v767_v19 = vmul.f32 %v766_v17, %v2042_v6 }
 0x429   :  { %455 = vrot.lane.b32.xlu1 %v453_v7, %s1899_s9  ;;  %444 = vrot.lane.b32.xlu0 %v442_v4, %s1900_s10  ;;  %v935_v22 = vmul.f32 %v934_v20, %v2042_v6  ;;  %v777_v23 = vmul.f32 %v776_v21, %v2042_v6  ;;  %v787_v26 = vmul.f32 %v786_v24, %v2042_v6  ;;  %v1290_v3 = vstv %s1737_s12  ;;  %s1728_s12 = sld [smem:[#allocation8 + $0x3c]] }
 0x42a   :  { %v629_v27 = vmul.f32 %v628_v25, %v2042_v6  ;;  %v1103_v30 = vmul.f32 %v1102_v28, %v2042_v6  ;;  %v945_v31 = vmul.f32 %v944_v29, %v2042_v6  ;;  %v797_v34 = vmul.f32 %v796_v32, %v2042_v6 }
 0x42b   :  { %v639_v35 = vmul.f32 %v638_v33, %v2042_v6  ;;  %v1113_v38 = vmul.f32 %v1112_v36, %v2042_v6  ;;  %v955_v39 = vmul.f32 %v954_v37, %v2042_v6  ;;  %v649_v42 = vmul.f32 %v648_v40, %v2042_v6 }
 0x42c   :  { %v1271_v43 = vmul.f32 %v1270_v41, %v2042_v6  ;;  %v965_v49 = vmul.f32 %v964_v47, %v2042_v6  ;;  %v807_v51 = vmul.f32 %v806_v48, %v2042_v6  ;;  %v1281_v54 = vmul.f32 %v1280_v52, %v2042_v6 }
 0x42d   :  { %477 = vrot.lane.b32.xlu1 %v475_v10, %s1901_s13  ;;  %466 = vrot.lane.b32.xlu0 %v464_v11, %s1902_s15  ;;  %v1123_v55 = vmul.f32 %v1122_v53, %v2042_v6  ;;  %v817_v60 = vmul.f32 %v816_v58, %v2042_v6  ;;  %v1439_v61 = vmul.f32 %v1438_v59, %v2042_v6  ;;  %v984_v7 = vstv %s1712_s16  ;;  %s1703_s16 = sld [smem:[#allocation8 + $0x4f]] }
 0x42e   :  { %v1133_v63 = vmul.f32 %v1132_v44, %v2042_v6  ;;  %v975_v0 = vmul.f32 %v974_v62, %v2042_v6  ;;  %v1449_v5 = vmul.f32 %v1448_v1, %v2042_v6  ;;  %v1291_v2 = vmul.f32 %v1290_v3, %v2042_v6 }
 0x42f   :  { %v1142_v4 = vstv %s1725_s17  ;;  %v985_v8 = vmul.f32 %v984_v7, %v2042_v6  ;;  %v1300_v10 = vstv %s1738_s18  ;;  %v1458_v11 = vstv %s1751_s0  ;;  %s1690_s17 = sld [smem:[#allocation8 + $0x55]]  ;;  %s1729_s18 = sld [smem:[#allocation8 + $0x43]] }
 0x430   :  { %v1143_v9 = vmul.f32 %v1142_v4, %v2042_v6  ;;  %v1301_v12 = vmul.f32 %v1300_v10, %v2042_v6  ;;  %v1459_v13 = vmul.f32 %v1458_v11, %v2042_v6  ;;  %v662_v24 = vstv %s1686_s1  ;;  %s1716_s0 = sld [smem:[#allocation8 + $0x49]]  ;;  %s1730_s1 = sld [smem:[#allocation8 + $0x4a]] }
 0x431   :  { %611 = vrot.lane.b32.xlu1 %v609_v14, %s1899_s9  ;;  %601 = vrot.lane.b32.xlu0 %v599_v15, %s1900_s10  ;;  %v1152_v14 = vstv %s1726_s19  ;;  %v1310_v15 = vstv %s1739_s20  ;;  %s1691_s19 = sld [smem:[#allocation8 + $0x5c]]  ;;  %s1742_s20 = sld [smem:[#allocation8 + $0x3d]] }
 0x432   :  { %v1153_v16 = vmul.f32 %v1152_v14, %v2042_v6  ;;  %v1311_v17 = vmul.f32 %v1310_v15, %v2042_v6  ;;  %v830_v28 = vstv %s1700_s3  ;;  %v682_v32 = vstv %s1688_s26  ;;  %s1756_s3 = sld [smem:[#allocation8 + $0x3e]]  ;;  %s1718_s26 = sld [smem:[#allocation8 + $0x57]] }
 0x433   :  { %v998_v36 = vstv %s1714_s28  ;;  %v850_v40 = vstv %s1702_s8  ;;  %v1166_v47 = vstv %s1728_s12  ;;  %s2173_s28 = sld [smem:[#allocation8 + $0x45]]  ;;  %s2179_s8 = sld [smem:[#allocation8 + $0x2]] }
 0x434   :  { %s2189_s12 = sld [smem:[#allocation8 + $0x5e]] }
 0x435   :  { %621 = vrot.lane.b32.xlu1 %v619_v18, %s1902_s15  ;;  %769 = vrot.lane.b32.xlu0 %v767_v19, %s1900_s10  ;;  %v1468_v18 = vstv %s1752_s2  ;;  %v1478_v19 = vstv %s1753_s21  ;;  %s1717_s2 = sld [smem:[#allocation8 + $0x50]]  ;;  %s1704_s21 = sld [smem:[#allocation8 + $0x56]] }
 0x436   :  { %v1469_v20 = vmul.f32 %v1468_v18, %v2042_v6  ;;  %v1479_v21 = vmul.f32 %v1478_v19, %v2042_v6  ;;  %v702_v52 = vstv %s1690_s17  ;;  %v1018_v58 = vstv %s1716_s0  ;;  %s2200_s17 = sld [smem:[#allocation8 + $0x4c]]  ;;  %s2214_s0 = sld [smem:[#allocation8 + $0x59]] }
 0x437   :  { %v1334_v44 = vstv %s1742_s20  ;;  %v1186_v7 = vstv %s1730_s1  ;;  %s2224_s20 = sld [smem:[#allocation8 + $0x4]]  ;;  %s2245_s1 = sld [smem:[#allocation8 + $0x5a]] }
 0x438   :  { %v1038_v18 = vstv %s1718_s26  ;;  %s2267_s26 = sld [smem:[#allocation8 + $0x3f]] }
 0x439   :  { %937 = vrot.lane.b32.xlu1 %v935_v22, %s1900_s10  ;;  %779 = vrot.lane.b32.xlu0 %v777_v23, %s1899_s9  ;;  %v2121_v22 = vld [vmem:[#allocation2 + $0x6] sm:$0x3f]  ;;  %v1320_v23 = vstv %s1740_s22  ;;  %s1743_s22 = sld [smem:[#allocation8 + $0x44]] }
 0x43a   :  { %v1321_v25 = vmul.f32 %v1320_v23, %v2042_v6  ;;  %v1187_v10 = vmul.f32 %v1186_v7, %v2121_v22 }
 0x43b   :  { %v870_v1 = vstv %s1704_s21  ;;  %s2232_s21 = sld [smem:[#allocation8 + $0x53]] }
 0x43d   :  { %789 = vrot.lane.b32.xlu1 %v787_v26, %s1902_s15  ;;  %631 = vrot.lane.b32.xlu0 %v629_v27, %s1901_s13  ;;  %v663_v26 = vmul.f32 %v662_v24, %v2121_v22  ;;  %v1488_v27 = vstv %s1754_s23  ;;  %s1705_s23 = sld [smem:[#allocation8 + $0x5d]]  ;;  %v1039_v24 = vmul.f32 %v1038_v18, %v2121_v22  ;;  %v1098_v18 = vstv %s2224_s20  ;;  %s1909_s20 = smov 123  }
 0x43e   :  { %v1489_v29 = vmul.f32 %v1488_v27, %v2042_v6  ;;  %v1512_v27 = vstv %s2173_s28  ;;  %s2275_s28 = sld [smem:[#allocation8 + $0x32]] }
 0x441   :  { %1105 = vrot.lane.b32.xlu1 %v1103_v30, %s1900_s10  ;;  %947 = vrot.lane.b32.xlu0 %v945_v31, %s1899_s9  ;;  %v831_v30 = vmul.f32 %v830_v28, %v2121_v22  ;;  %v672_v31 = vstv %s1687_s25  ;;  %s1731_s25 = sld [smem:[#allocation8 + $0x51]] }
 0x442   :  { %v673_v33 = vmul.f32 %v672_v31, %v2121_v22  ;;  %v762_v31 = vstv %s2179_s8  ;;  %s2287_s8 = sld [smem:[#allocation8 + $0x46]] }
 0x443   :  { %v880_v11 = vstv %s1705_s23  ;;  %s2252_s23 = sld [smem:[#allocation8 + $0x2a]] }
 0x444   :  { %v881_v15 = vmul.f32 %v880_v11, %v2121_v22 }
 0x445   :  { %799 = vrot.lane.b32.xlu1 %v797_v34, %s1901_s13  ;;  %641 = vrot.lane.b32.xlu0 %v639_v35, %s1903_s24  ;;  %v683_v34 = vmul.f32 %v682_v32, %v2121_v22  ;;  %v840_v35 = vstv %s1701_s27  ;;  %s2165_s27 = sld [smem:[#allocation8 + $0x1]] }
 0x446   :  { %v841_v37 = vmul.f32 %v840_v35, %v2121_v22 }
 0x449   :  { %1115 = vrot.lane.b32.xlu1 %v1113_v38, %s1899_s9  ;;  %957 = vrot.lane.b32.xlu0 %v955_v39, %s1902_s15  ;;  %v999_v38 = vmul.f32 %v998_v36, %v2121_v22  ;;  %v692_v39 = vstv %s1689_s30  ;;  %s2175_s30 = sld [smem:[#allocation8 + $0x4b]]  ;;  %v1513_v36 = vmul.f32 %v1512_v27, %v2121_v22 }
 0x44a   :  { %v693_v41 = vmul.f32 %v692_v39, %v2121_v22 }
 0x44b   :  { %v594_v19 = vstv %s2165_s27  ;;  %s2273_s27 = sld [smem:[#allocation8 + $0x38]] }
 0x44d   :  { %651 = vrot.lane.b32.xlu1 %v649_v42, %s1904_s29  ;;  %1273 = vrot.lane.b32.xlu0 %v1271_v43, %s1900_s10  ;;  %v851_v42 = vmul.f32 %v850_v40, %v2121_v22  ;;  %v1008_v43 = vstv %s1715_s11  ;;  %s2181_s11 = sld [smem:[#allocation8 + $0x58]] }
 0x44e   :  { %v1009_v48 = vmul.f32 %v1008_v43, %v2121_v22  ;;  %v763_v43 = vmul.f32 %v762_v31, %v2042_v6 }
 0x44f   :  { %v1354_v28 = vstv %s2175_s30  ;;  %s2285_s30 = sld [smem:[#allocation8 + $0x4d]] }
 0x451   :  { %967 = vrot.lane.b32.xlu1 %v965_v49, %s1901_s13  ;;  %809 = vrot.lane.b32.xlu0 %v807_v51, %s1903_s24  ;;  %v1167_v49 = vmul.f32 %v1166_v47, %v2121_v22  ;;  %v860_v51 = vstv %s1703_s16  ;;  %s2194_s16 = sld [smem:[#allocation8 + $0x3]] }
 0x452   :  { %v861_v53 = vmul.f32 %v860_v51, %v2121_v22 }
 0x453   :  { %v1206_v32 = vstv %s2181_s11  ;;  %s2298_s11 = sld [smem:[#allocation8 + $0x5b]] }
 0x455   :  { %1283 = vrot.lane.b32.xlu1 %v1281_v54, %s1899_s9  ;;  %1125 = vrot.lane.b32.xlu0 %v1123_v55, %s1902_s15  ;;  %v703_v54 = vmul.f32 %v702_v52, %v2121_v22  ;;  %v1176_v55 = vstv %s1729_s18  ;;  %s2202_s18 = sld [smem:[#allocation8 + $0x52]] }
 0x456   :  { %v1177_v59 = vmul.f32 %v1176_v55, %v2121_v22  ;;  %v1207_v55 = vmul.f32 %v1206_v32, %v2121_v22 }
 0x459   :  { %819 = vrot.lane.b32.xlu1 %v817_v60, %s1904_s29  ;;  %1441 = vrot.lane.b32.xlu0 %v1439_v61, %s1900_s10  ;;  %v1019_v60 = vmul.f32 %v1018_v58, %v2121_v22  ;;  %v712_v61 = vstv %s1691_s19  ;;  %s2216_s19 = sld [smem:[#allocation8 + $0x5f]] }
 0x45a   :  { %v713_v62 = vmul.f32 %v712_v61, %v2121_v22  ;;  %v1522_v61 = vstv %s2200_s17  ;;  %s2315_s17 = sld [smem:[#allocation8 + $0x33]] }
 0x45b   :  { %v1523_v7 = vmul.f32 %v1522_v61, %v2121_v22 }
 0x45d   :  { %1135 = vrot.lane.b32.xlu1 %v1133_v63, %s1901_s13  ;;  %977 = vrot.lane.b32.xlu0 %v975_v0, %s1903_s24  ;;  %v1335_v63 = vmul.f32 %v1334_v44, %v2121_v22  ;;  %v1028_v0 = vstv %s1717_s2  ;;  %v1364_v44 = vstv %s2202_s18  ;;  %s2230_s2 = sld [smem:[#allocation8 + $0x60]]  ;;  %s1907_s18 = smov 125  }
 0x45e   :  { %v1029_v3 = vmul.f32 %v1028_v0, %v2121_v22 }
 0x461   :  { %1451 = vrot.lane.b32.xlu1 %v1449_v5, %s1899_s9  ;;  %1293 = vrot.lane.b32.xlu0 %v1291_v2, %s1902_s15  ;;  %v871_v5 = vmul.f32 %v870_v1, %v2121_v22  ;;  %v1344_v2 = vstv %s1743_s22  ;;  %s2243_s22 = sld [smem:[#allocation8 + $0x61]] }
 0x465   :  { %987 = vrot.lane.b32.xlu1 %v985_v8, %s1904_s29  ;;  %1145 = vrot.lane.b32.xlu0 %v1143_v9, %s1903_s24  ;;  %v1345_v9 = vmul.f32 %v1344_v2, %v2121_v22 }
 0x469   :  { %1303 = vrot.lane.b32.xlu1 %v1301_v12, %s1901_s13  ;;  %1461 = vrot.lane.b32.xlu0 %v1459_v13, %s1902_s15  ;;  %v1502_v12 = vstv %s1756_s3  ;;  %s2258_s3 = sld [smem:[#allocation8 + $0x23]] }
 0x46d   :  { %1155 = vrot.lane.b32.xlu1 %v1153_v16, %s1904_s29  ;;  %1313 = vrot.lane.b32.xlu0 %v1311_v17, %s1903_s24  ;;  %v1503_v16 = vmul.f32 %v1502_v12, %v2121_v22  ;;  %v1196_v17 = vstv %s1731_s25  ;;  %v1374_v12 = vstv %s2214_s0  ;;  %s2263_s25 = sld [smem:[#allocation8 + $0x5]]  ;;  %s2466_s0 = sld [smem:[#allocation8 + $0x31]] }
 0x46e   :  { %v1197_v23 = vmul.f32 %v1196_v17, %v2121_v22 }
 0x471   :  { %1471 = vrot.lane.b32.xlu1 %v1469_v20, %s1901_s13  ;;  %1481 = vrot.lane.b32.xlu0 %v1479_v21, %s1903_s24 }
 0x473   :  { %v1266_v61 = vstv %s2263_s25 }
 0x475   :  { %1323 = vrot.lane.b32.xlu1 %v1321_v25, %s1904_s29  ;;  %665 = vrot.lane.b32.xlu0 %v663_v26, %s1900_s10 }
 0x479   :  { %1491 = vrot.lane.b32.xlu1 %v1489_v29, %s1904_s29  ;;  %833 = vrot.lane.b32.xlu0 %v831_v30, %s1900_s10  ;;  %v595_v29 = vmul.f32 %v594_v19, %v2042_v6 }
 0x47d   :  { %675 = vrot.lane.b32.xlu1 %v673_v33, %s1899_s9  ;;  %685 = vrot.lane.b32.xlu0 %v683_v34, %s1902_s15 }
 0x481   :  { %843 = vrot.lane.b32.xlu1 %v841_v37, %s1899_s9  ;;  %1001 = vrot.lane.b32.xlu0 %v999_v38, %s1900_s10  ;;  %v1355_v37 = vmul.f32 %v1354_v28, %v2121_v22  ;;  %v1384_v28 = vstv %s2230_s2  ;;  %s1910_s2 = smov 122  }
 0x485   :  { %695 = vrot.lane.b32.xlu1 %v693_v41, %s1901_s13  ;;  %853 = vrot.lane.b32.xlu0 %v851_v42, %s1902_s15  ;;  %v1048_v41 = vstv %s2189_s12  ;;  %s2300_s12 = sld [smem:[#allocation8 + $0x54]] }
 0x486   :  { %v1049_v58 = vmul.f32 %v1048_v41, %v2121_v22  ;;  %v1552_v41 = vstv %s2243_s22 }
 0x489   :  { %1011 = vrot.lane.b32.xlu1 %v1009_v48, %s1899_s9  ;;  %1169 = vrot.lane.b32.xlu0 %v1167_v49, %s1900_s10  ;;  %v930_v49 = vstv %s2194_s16  ;;  %s2309_s16 = sld [smem:[#allocation8 + $0x6]] }
 0x48d   :  { %863 = vrot.lane.b32.xlu1 %v861_v53, %s1901_s13  ;;  %705 = vrot.lane.b32.xlu0 %v703_v54, %s1903_s24 }
 0x491   :  { %1179 = vrot.lane.b32.xlu1 %v1177_v59, %s1899_s9  ;;  %1021 = vrot.lane.b32.xlu0 %v1019_v60, %s1902_s15 }
 0x495   :  { %715 = vrot.lane.b32.xlu1 %v713_v62, %s1904_s29  ;;  %1337 = vrot.lane.b32.xlu0 %v1335_v63, %s1900_s10  ;;  %v931_v62 = vmul.f32 %v930_v49, %v2042_v6 }
 0x499   :  { %1031 = vrot.lane.b32.xlu1 %v1029_v3, %s1901_s13  ;;  %873 = vrot.lane.b32.xlu0 %v871_v5, %s1903_s24 }
 0x49b   :  { %v2167_v4 = vpop.permute.xlu0 %444  ;;  %v2169_v8 = vpop.permute.xlu1 %455 }
 0x49d   :  { %1347 = vrot.lane.b32.xlu1 %v1345_v9, %s1899_s9  ;;  %1189 = vrot.lane.b32.xlu0 %v1187_v10, %s1902_s15  ;;  %v1365_v9 = vmul.f32 %v1364_v44, %v2121_v22 }
 0x49f   :  { %v2183_v13 = vpop.permute.xlu0 %466  ;;  %v2185_v14 = vpop.permute.xlu1 %477 }
 0x4a1   :  { %883 = vrot.lane.b32.xlu1 %v881_v15, %s1904_s29  ;;  %1505 = vrot.lane.b32.xlu0 %v1503_v16, %s1900_s10  ;;  %v1216_v15 = vstv %s2216_s19  ;;  %s1908_s19 = smov 124  }
 0x4a3   :  { %v602_v20 = vpop.permute.xlu0 %601  ;;  %v612_v21 = vpop.permute.xlu1 %611 }
 0x4a4   :  { %v603_v25 = vrot.slane %v602_v20, 2  ;;  %v613_v26 = vrot.slane %v612_v21, 2 }
 0x4a5   :  { %1199 = vrot.lane.b32.xlu1 %v1197_v23, %s1901_s13  ;;  %1041 = vrot.lane.b32.xlu0 %v1039_v24, %s1903_s24  ;;  %v1375_v24 = vmul.f32 %v1374_v12, %v2121_v22  ;;  %v658_v12 = vstv %s2275_s28 }
 0x4a6   :  { %v604_v30 = vsel %vm447_vm12, %v602_v20, %v603_v25  ;;  %v614_v38 = vsel %vm458_vm13, %v612_v21, %v613_v26  ;;  %v1217_v25 = vmul.f32 %v1216_v15, %v2121_v22  ;;  %v1267_v15 = vmul.f32 %v1266_v61, %v2042_v6 }
 0x4a7   :  { %v606_v33 = vadd.f32 %v604_v30, %v595_v29  ;;  %v770_v34 = vpop.permute.xlu0 %769  ;;  %v622_v35 = vpop.permute.xlu1 %621  ;;  %v1532_v29 = vstv %s2232_s21  ;;  %v1099_v30 = vmul.f32 %v1098_v18, %v2042_v6 }
 0x4a8   :  { %v771_v39 = vrot.slane %v770_v34, 2  ;;  %v623_v40 = vrot.slane %v622_v35, 2 }
 0x4a9   :  { %v616_v42 = vadd.f32 %v614_v38, %v606_v33  ;;  %1515 = vrot.lane.b32.xlu1 %v1513_v36, %s1899_s9  ;;  %1357 = vrot.lane.b32.xlu0 %v1355_v37, %s1902_s15  ;;  %v1385_v37 = vmul.f32 %v1384_v28, %v2121_v22  ;;  %v1533_v38 = vmul.f32 %v1532_v29, %v2121_v22  ;;  %v541_v28 = vstv %s2285_s30 }
 0x4aa   :  { %v772_v47 = vsel %vm447_vm12, %v770_v34, %v771_v39  ;;  %v624_v48 = vsel %vm469_vm14, %v622_v35, %v623_v40  ;;  %v531_v29 = vstv %s2287_s8 }
 0x4ab   :  { %v774_v51 = vadd.f32 %v772_v47, %v763_v43  ;;  %v626_v52 = vadd.f32 %v624_v48, %v616_v42  ;;  %v780_v53 = vpop.permute.xlu0 %779  ;;  %v938_v54 = vpop.permute.xlu1 %937  ;;  %v1542_v42 = vstv %s2245_s1  ;;  %v496_v48 = vstv %s2252_s23 }
 0x4ac   :  { %v781_v59 = vrot.slane %v780_v53, 2  ;;  %v939_v60 = vrot.slane %v938_v54, 2 }
 0x4ad   :  { %1209 = vrot.lane.b32.xlu1 %v1207_v55, %s1903_s24  ;;  %1051 = vrot.lane.b32.xlu0 %v1049_v58, %s1904_s29  ;;  %v1543_v55 = vmul.f32 %v1542_v42, %v2121_v22  ;;  %v551_v42 = vstv %s2300_s12 }
 0x4ae   :  { %v782_v63 = vsel %vm458_vm13, %v780_v53, %v781_v59  ;;  %v940_v0 = vsel %vm447_vm12, %v938_v54, %v939_v60  ;;  %v1553_v54 = vmul.f32 %v1552_v41, %v2121_v22  ;;  %v485_v60 = vstv %s2258_s3 }
 0x4af   :  { %v784_v1 = vadd.f32 %v782_v63, %v774_v51  ;;  %v942_v3 = vadd.f32 %v940_v0, %v931_v62  ;;  %v632_v5 = vpop.permute.xlu0 %631  ;;  %v790_v2 = vpop.permute.xlu1 %789  ;;  %v497_v63 = vmul.f32 %v496_v48, %v2042_v6  ;;  %v521_v0 = vstv %s2267_s26 }
 0x4b0   :  { %v633_v10 = vrot.slane %v632_v5, 2  ;;  %v791_v11 = vrot.slane %v790_v2, 2  ;;  %v522_v18 = vmul.f32 %v521_v0, %v2121_v22  ;;  %v561_v41 = vstv %s2298_s11 }
 0x4b1   :  { %1525 = vrot.lane.b32.xlu1 %v1523_v7, %s1902_s15  ;;  %1367 = vrot.lane.b32.xlu0 %v1365_v9, %s1901_s13  ;;  %v486_v7 = vmul.f32 %v485_v60, %v2042_v6  ;;  %v1434_v48 = vstv %s2309_s16  ;;  %v826_v60 = vstv %s2315_s17 }
 0x4b2   :  { %v634_v16 = vsel %vm480_vm15, %v632_v5, %v633_v10  ;;  %v792_v17 = vsel %vm469_vm14, %v790_v2, %v791_v11  ;;  %v511_v11 = vstv %s2273_s27  ;;  %v1435_v61 = vmul.f32 %v1434_v48, %v2042_v6 }
 0x4b3   :  { %v636_v19 = vadd.f32 %v634_v16, %v626_v52  ;;  %v794_v20 = vadd.f32 %v792_v17, %v784_v1  ;;  %v948_v21 = vpop.permute.xlu0 %947  ;;  %v1106_v23 = vpop.permute.xlu1 %1105 }
 0x4b4   :  { %v949_v26 = vrot.slane %v948_v21, 2  ;;  %v1107_v27 = vrot.slane %v1106_v23, 2 }
 0x4b5   :  { %1377 = vrot.lane.b32.xlu1 %v1375_v24, %s1903_s24  ;;  %1219 = vrot.lane.b32.xlu0 %v1217_v25, %s1904_s29  ;;  %v512_v24 = vmul.f32 %v511_v11, %v2121_v22  ;;  %v659_v25 = vmul.f32 %v658_v12, %v2121_v22 }
 0x4b6   :  { %v950_v31 = vsel %vm458_vm13, %v948_v21, %v949_v26  ;;  %v1108_v32 = vsel %vm447_vm12, %v1106_v23, %v1107_v27 }
 0x4b7   :  { %v952_v33 = vadd.f32 %v950_v31, %v942_v3  ;;  %v1110_v34 = vadd.f32 %v1108_v32, %v1099_v30  ;;  %v642_v35 = vpop.permute.xlu0 %641  ;;  %v800_v36 = vpop.permute.xlu1 %799 }
 0x4b8   :  { %v643_v39 = vrot.slane %v642_v35, 2  ;;  %v801_v40 = vrot.slane %v800_v36, 2 }
 0x4b9   :  { %1387 = vrot.lane.b32.xlu1 %v1385_v37, %s1904_s29  ;;  %1535 = vrot.lane.b32.xlu0 %v1533_v38, %s1901_s13  ;;  %v542_v37 = vmul.f32 %v541_v28, %v2121_v22  ;;  %v532_v38 = vmul.f32 %v531_v29, %v2121_v22 }
 0x4ba   :  { %v644_v43 = vsel %vm491_vm0, %v642_v35, %v643_v39  ;;  %v802_v47 = vsel %vm480_vm15, %v800_v36, %v801_v40 }
 0x4bb   :  { %v646_v49 = vadd.f32 %v644_v43, %v636_v19  ;;  %v804_v51 = vadd.f32 %v802_v47, %v794_v20  ;;  %v958_v52 = vpop.permute.xlu0 %957  ;;  %v1116_v53 = vpop.permute.xlu1 %1115 }
 0x4bc   :  { %v959_v58 = vrot.slane %v958_v52, 2  ;;  %v1117_v59 = vrot.slane %v1116_v53, 2 }
 0x4bd   :  { %1555 = vrot.lane.b32.xlu1 %v1553_v54, %s1904_s29  ;;  %1545 = vrot.lane.b32.xlu0 %v1543_v55, %s1903_s24  ;;  %v562_v54 = vmul.f32 %v561_v41, %v2121_v22  ;;  %v552_v55 = vmul.f32 %v551_v42, %v2121_v22 }
 0x4be   :  { %v960_v44 = vsel %vm469_vm14, %v958_v52, %v959_v58  ;;  %v1118_v62 = vsel %vm458_vm13, %v1116_v53, %v1117_v59 }
 0x4bf   :  { %v962_v1 = vadd.f32 %v960_v44, %v952_v33  ;;  %v1120_v3 = vadd.f32 %v1118_v62, %v1110_v34  ;;  %v1274_v5 = vpop.permute.xlu0 %1273  ;;  %v652_v2 = vpop.permute.xlu1 %651 }
 0x4c0   :  { %v1275_v9 = vrot.slane %v1274_v5, 2  ;;  %v653_v10 = vrot.slane %v652_v2, 2 }
 0x4c1   :  { %499 = vrot.lane.b32.xlu1 %v497_v63, %s1904_s29  ;;  %488 = vrot.lane.b32.xlu0 %v486_v7, %s1903_s24 }
 0x4c2   :  { %v1276_v16 = vsel %vm447_vm12, %v1274_v5, %v1275_v9  ;;  %v654_v17 = vsel %vm502_vm1, %v652_v2, %v653_v10  ;;  %v827_v5 = vmul.f32 %v826_v60, %v2121_v22 }
 0x4c3   :  { %v1278_v19 = vadd.f32 %v1276_v16, %v1267_v15  ;;  %v656_v20 = vadd.f32 %v654_v17, %v646_v49  ;;  %v810_v21 = vpop.permute.xlu0 %809  ;;  %v968_v23 = vpop.permute.xlu1 %967 }
 0x4c4   :  { %v811_v26 = vrot.slane %v810_v21, 2  ;;  %v969_v27 = vrot.slane %v968_v23, 2 }
 0x4c5   :  { %524 = vrot.lane.b32.xlu1 %v522_v18, %s1899_s9  ;;  %514 = vrot.lane.b32.xlu0 %v512_v24, %s1900_s10  ;;  %v2319_v30 = vadd.f32 %v659_v25, %v656_v20  ;;  %s1713_s9 = sld [smem:[#allocation8 + $0x34]]  ;;  %s1727_s10 = sld [smem:[#allocation8 + $0x35]] }
 0x4c6   :  { %v812_v31 = vsel %vm491_vm0, %v810_v21, %v811_v26  ;;  %v970_v32 = vsel %vm480_vm15, %v968_v23, %v969_v27 }
 0x4c7   :  { %v814_v33 = vadd.f32 %v812_v31, %v804_v51  ;;  %v972_v34 = vadd.f32 %v970_v32, %v962_v1  ;;  %v1126_v35 = vpop.permute.xlu0 %1125  ;;  %v1284_v36 = vpop.permute.xlu1 %1283 }
 0x4c8   :  { %v1127_v39 = vrot.slane %v1126_v35, 2  ;;  %v1285_v40 = vrot.slane %v1284_v36, 2 }
 0x4c9   :  { %544 = vrot.lane.b32.xlu1 %v542_v37, %s1901_s13  ;;  %534 = vrot.lane.b32.xlu0 %v532_v38, %s1902_s15  ;;  %s1741_s13 = sld [smem:[#allocation8 + $0x36]]  ;;  %s1755_s15 = sld [smem:[#allocation8 + $0x37]] }
 0x4ca   :  { %v1128_v43 = vsel %vm469_vm14, %v1126_v35, %v1127_v39  ;;  %v1286_v47 = vsel %vm458_vm13, %v1284_v36, %v1285_v40 }
 0x4cb   :  { %v1130_v49 = vadd.f32 %v1128_v43, %v1120_v3  ;;  %v1288_v51 = vadd.f32 %v1286_v47, %v1278_v19  ;;  %v1442_v52 = vpop.permute.xlu0 %1441  ;;  %v820_v53 = vpop.permute.xlu1 %819  ;;  %v994_v28 = vstv %s1713_s9 }
 0x4cc   :  { %v1443_v58 = vrot.slane %v1442_v52, 2  ;;  %v821_v59 = vrot.slane %v820_v53, 2  ;;  %v995_v36 = vmul.f32 %v994_v28, %v2121_v22 }
 0x4cd   :  { %564 = vrot.lane.b32.xlu1 %v562_v54, %s1904_s29  ;;  %554 = vrot.lane.b32.xlu0 %v552_v55, %s1903_s24  ;;  %s1906_s24 = smov 127   ;;  %s2403_s29 = sld [smem:[#allocation8]] }
 0x4ce   :  { %v1444_v44 = vsel %vm447_vm12, %v1442_v52, %v1443_v58  ;;  %v822_v62 = vsel %vm502_vm1, %v820_v53, %v821_v59 }
 0x4cf   :  { %v1446_v63 = vadd.f32 %v1444_v44, %v1435_v61  ;;  %v824_v0 = vadd.f32 %v822_v62, %v814_v33  ;;  %v978_v1 = vpop.permute.xlu0 %977  ;;  %v1136_v3 = vpop.permute.xlu1 %1135 }
 0x4d0   :  { %v979_v2 = vrot.slane %v978_v1, 2  ;;  %v1137_v7 = vrot.slane %v1136_v3, 2 }
 0x4d1   :  { %v2341_v9 = vadd.f32 %v827_v5, %v824_v0 }
 0x4d2   :  { %v980_v6 = vsel %vm491_vm0, %v978_v1, %v979_v2  ;;  %v1138_v10 = vsel %vm480_vm15, %v1136_v3, %v1137_v7  ;;  %v1330_v7 = vstv %s1741_s13 }
 0x4d3   :  { %v982_v11 = vadd.f32 %v980_v6, %v972_v34  ;;  %v1140_v12 = vadd.f32 %v1138_v10, %v1130_v49  ;;  %v1294_v15 = vpop.permute.xlu0 %1293  ;;  %v1452_v16 = vpop.permute.xlu1 %1451 }
 0x4d4   :  { %v1295_v17 = vrot.slane %v1294_v15, 2  ;;  %v1453_v18 = vrot.slane %v1452_v16, 2 }
 0x4d6   :  { %v1296_v19 = vsel %vm469_vm14, %v1294_v15, %v1295_v17  ;;  %v1454_v20 = vsel %vm458_vm13, %v1452_v16, %v1453_v18  ;;  %v1331_v17 = vmul.f32 %v1330_v7, %v2121_v22 }
 0x4d7   :  { %v1298_v21 = vadd.f32 %v1296_v19, %v1288_v51  ;;  %v1456_v23 = vadd.f32 %v1454_v20, %v1446_v63  ;;  %v1146_v24 = vpop.permute.xlu0 %1145  ;;  %v988_v25 = vpop.permute.xlu1 %987  ;;  %v1162_v51 = vstv %s1727_s10  ;;  %v1498_v19 = vstv %s1755_s15 }
 0x4d8   :  { %v1147_v26 = vrot.slane %v1146_v24, 2  ;;  %v989_v27 = vrot.slane %v988_v25, 2  ;;  %v1163_v59 = vmul.f32 %v1162_v51, %v2121_v22 }
 0x4da   :  { %v1148_v29 = vsel %vm491_vm0, %v1146_v24, %v1147_v26  ;;  %v990_v31 = vsel %vm502_vm1, %v988_v25, %v989_v27  ;;  %v1499_v26 = vmul.f32 %v1498_v19, %v2121_v22 }
 0x4db   :  { %v1150_v32 = vadd.f32 %v1148_v29, %v1140_v12  ;;  %v992_v33 = vadd.f32 %v990_v31, %v982_v11  ;;  %v1462_v34 = vpop.permute.xlu0 %1461  ;;  %v1304_v35 = vpop.permute.xlu1 %1303 }
 0x4dc   :  { %v1463_v37 = vrot.slane %v1462_v34, 2  ;;  %v1305_v38 = vrot.slane %v1304_v35, 2 }
 0x4dd   :  { %v2350_v39 = vadd.f32 %v995_v36, %v992_v33 }
 0x4de   :  { %v1464_v40 = vsel %vm469_vm14, %v1462_v34, %v1463_v37  ;;  %v1306_v41 = vsel %vm480_vm15, %v1304_v35, %v1305_v38 }
 0x4df   :  { %v1466_v42 = vadd.f32 %v1464_v40, %v1456_v23  ;;  %v1308_v43 = vadd.f32 %v1306_v41, %v1298_v21  ;;  %v1314_v47 = vpop.permute.xlu0 %1313  ;;  %v1156_v48 = vpop.permute.xlu1 %1155 }
 0x4e0   :  { %v1157_v49 = vrot.slane %v1156_v48, 2  ;;  %v1315_v52 = vrot.slane %v1314_v47, 2 }
 0x4e2   :  { %v1158_v53 = vsel %vm502_vm1, %v1156_v48, %v1157_v49  ;;  %v1316_v62 = vsel %vm491_vm0, %v1314_v47, %v1315_v52  ;;  %v1905_v48 = vmov 1983009808  }
 0x4e3   :  { %v1160_v54 = vadd.f32 %v1158_v53, %v1150_v32  ;;  %v1482_v55 = vpop.permute.xlu0 %1481  ;;  %v1472_v58 = vpop.permute.xlu1 %1471  ;;  %v1318_v6 = vadd.f32 %v1316_v62, %v1308_v43  ;;  %v580_v49 = vunpack.c.l.s4 %v1905_v48 }
 0x4e4   :  { %v1483_v60 = vrot.slane %v1482_v55, 2  ;;  %v1473_v61 = vrot.slane %v1472_v58, 2 }
 0x4e5   :  { %v2356_v44 = vadd.f32 %v1163_v59, %v1160_v54  ;;  %v581_v59 = vunpack.c.0.s8 %v580_v49 }
 0x4e6   :  { %v1474_v63 = vsel %vm480_vm15, %v1472_v58, %v1473_v61  ;;  %v1484_v5 = vsel %vm491_vm0, %v1482_v55, %v1483_v60 }
 0x4e7   :  { %v1476_v0 = vadd.f32 %v1474_v63, %v1466_v42  ;;  %v666_v1 = vpop.permute.xlu0 %665  ;;  %v1324_v3 = vpop.permute.xlu1 %1323 }
 0x4e8   :  { %v1325_v2 = vrot.slane %v1324_v3, 2  ;;  %v667_v33 = vrot.slane %v666_v1, 2 }
 0x4e9   :  { %v1486_v10 = vadd.f32 %v1484_v5, %v1476_v0  ;;  %v2382_v5 = vsub.s32 %v581_v59, %v2008_v50 }
 0x4ea   :  { %v1326_v11 = vsel %vm502_vm1, %v1324_v3, %v1325_v2  ;;  %v668_v37 = vsel %vm447_vm12, %v666_v1, %v667_v33 }
 0x4eb   :  { %v1328_v12 = vadd.f32 %v1326_v11, %v1318_v6  ;;  %v834_v15 = vpop.permute.xlu0 %833  ;;  %v1492_v16 = vpop.permute.xlu1 %1491  ;;  %v670_v40 = vadd.f32 %v668_v37, %v2319_v30 }
 0x4ec   :  { %v1493_v18 = vrot.slane %v1492_v16, 2  ;;  %v835_v60 = vrot.slane %v834_v15, 2 }
 0x4ed   :  { %v2363_v20 = vadd.f32 %v1331_v17, %v1328_v12 }
 0x4ee   :  { %v1494_v21 = vsel %vm502_vm1, %v1492_v16, %v1493_v18  ;;  %v836_v2 = vsel %vm447_vm12, %v834_v15, %v835_v60 }
 0x4ef   :  { %v1496_v23 = vadd.f32 %v1494_v21, %v1486_v10  ;;  %v686_v24 = vpop.permute.xlu0 %685  ;;  %v676_v25 = vpop.permute.xlu1 %675  ;;  %v838_v18 = vadd.f32 %v836_v2, %v2341_v9  ;;  %v437_v2 = vstv %s2403_s29 }
 0x4f0   :  { %v677_v34 = vrot.slane %v676_v25, 2  ;;  %v687_v22 = vrot.slane %v686_v24, 2 }
 0x4f1   :  { %v2367_v27 = vadd.f32 %v1499_v26, %v1496_v23 }
 0x4f2   :  { %v678_v38 = vsel %vm458_vm13, %v676_v25, %v677_v34  ;;  %v688_v54 = vsel %vm469_vm14, %v686_v24, %v687_v22 }
 0x4f3   :  { %v1002_v28 = vpop.permute.xlu0 %1001  ;;  %v844_v29 = vpop.permute.xlu1 %843  ;;  %v680_v47 = vadd.f32 %v678_v38, %v670_v40 }
 0x4f4   :  { %v845_v0 = vrot.slane %v844_v29, 2 }
 0x4f5   :  { %v690_v58 = vadd.f32 %v688_v54, %v680_v47 }
 0x4f6   :  { %v846_v16 = vsel %vm458_vm13, %v844_v29, %v845_v0 }
 0x4f7   :  { %v854_v31 = vpop.permute.xlu0 %853  ;;  %v696_v32 = vpop.permute.xlu1 %695  ;;  %v848_v15 = vadd.f32 %v846_v16, %v838_v18 }
 0x4f8   :  { %v697_v43 = vrot.slane %v696_v32, 2  ;;  %v855_v7 = vrot.slane %v854_v31, 2 }
 0x4fa   :  { %v698_v55 = vsel %vm480_vm15, %v696_v32, %v697_v43  ;;  %v856_v21 = vsel %vm469_vm14, %v854_v31, %v855_v7  ;;  %v1003_v32 = vrot.slane %v1002_v28, 2 }
 0x4fb   :  { %v2369_v35 = vpop.permute.xlu0 %1169  ;;  %v1012_v36 = vpop.permute.xlu1 %1011  ;;  %v700_v61 = vadd.f32 %v698_v55, %v690_v58  ;;  %v858_v29 = vadd.f32 %v856_v21, %v848_v15 }
 0x4fc   :  { %v1013_v38 = vrot.slane %v1012_v36, 2 }
 0x4fe   :  { %v1014_v49 = vsel %vm458_vm13, %v1012_v36, %v1013_v38 }
 0x4ff   :  { %v706_v41 = vpop.permute.xlu0 %705  ;;  %v864_v42 = vpop.permute.xlu1 %863 }
 0x500   :  { %v707_v51 = vrot.slane %v706_v41, 2  ;;  %v865_v17 = vrot.slane %v864_v42, 2 }
 0x502   :  { %v708_v30 = vsel %vm491_vm0, %v706_v41, %v707_v51  ;;  %v866_v26 = vsel %vm480_vm15, %v864_v42, %v865_v17  ;;  %v1004_v41 = vsel %vm447_vm12, %v1002_v28, %v1003_v32  ;;  %v1171_v28 = vrot.slane %v2369_v35, 2 }
 0x503   :  { %v1022_v52 = vpop.permute.xlu0 %1021  ;;  %v2374_v53 = vpop.permute.xlu1 %1179  ;;  %v710_v3 = vadd.f32 %v708_v30, %v700_v61  ;;  %v868_v33 = vadd.f32 %v866_v26, %v858_v29  ;;  %v1006_v54 = vadd.f32 %v1004_v41, %v2350_v39 }
 0x504   :  { %v1023_v22 = vrot.slane %v1022_v52, 2  ;;  %v1181_v36 = vrot.slane %v2374_v53, 2 }
 0x505   :  { %v1016_v60 = vadd.f32 %v1014_v49, %v1006_v54 }
 0x506   :  { %v1024_v58 = vsel %vm469_vm14, %v1022_v52, %v1023_v22  ;;  %v1182_v16 = vsel %vm458_vm13, %v2374_v53, %v1181_v36 }
 0x507   :  { %v2379_v62 = vpop.permute.xlu0 %1337  ;;  %v716_v63 = vpop.permute.xlu1 %715 }
 0x508   :  { %v717_v1 = vrot.slane %v716_v63, 2  ;;  %v1339_v0 = vrot.slane %v2379_v62, 2 }
 0x50a   :  { %v718_v6 = vsel %vm502_vm1, %v716_v63, %v717_v1  ;;  %v1026_v63 = vadd.f32 %v1024_v58, %v1016_v60  ;;  %v1172_v1 = vsel %vm447_vm12, %v2369_v35, %v1171_v28  ;;  %v1340_v35 = vsel %vm447_vm12, %v2379_v62, %v1339_v0  ;;  %v1820_v62 = vld [vmem:[#allocation2] sm:$0x3f] }
 0x50b   :  { %v2386_v10 = vadd.f32 %v718_v6, %v710_v3  ;;  %v874_v11 = vpop.permute.xlu0 %873  ;;  %v1032_v12 = vpop.permute.xlu1 %1031  ;;  %v438_v22 = vmul.f32 %v1820_v62, %v437_v2 }
 0x50c   :  { %v875_v23 = vrot.slane %v874_v11, 2  ;;  %v1033_v51 = vrot.slane %v1032_v12, 2 }
 0x50d   :  { %v2392_v19 = vrot.slane %v2386_v10, %v2382_v5 }
 0x50e   :  { %v876_v9 = vsel %vm491_vm0, %v874_v11, %v875_v23  ;;  %v1034_v39 = vsel %vm480_vm15, %v1032_v12, %v1033_v51  ;;  %v446_v12 = vrot.slane %v2167_v4, 2  ;;  %v1174_v23 = vadd.f32 %v1172_v1, %v2356_v44 }
 0x50f   :  { %v1190_v24 = vpop.permute.xlu0 %1189  ;;  %746 = vrot.lane.b32.xlu0 %v2392_v19, %s1906_s24  ;;  %v1348_v25 = vpop.permute.xlu1 %1347  ;;  %v878_v40 = vadd.f32 %v876_v9, %v868_v33  ;;  %v1036_v7 = vadd.f32 %v1034_v39, %v1026_v63 }
 0x510   :  { %v1191_v3 = vrot.slane %v1190_v24, 2  ;;  %v1349_v17 = vrot.slane %v1348_v25, 2  ;;  %v1184_v33 = vadd.f32 %v1182_v16, %v1174_v23  ;;  %v448_v49 = vsel %vm447_vm12, %v2167_v4, %v446_v12 }
 0x511   :  { %v450_v63 = vadd.f32 %v448_v49, %v438_v22 }
 0x512   :  { %v1192_v26 = vsel %vm469_vm14, %v1190_v24, %v1191_v3  ;;  %v1342_v24 = vadd.f32 %v1340_v35, %v2363_v20  ;;  %v468_v3 = vrot.slane %v2183_v13, 2 }
 0x513   :  { %v2399_v34 = vpop.permute.xlu0 %1505  ;;  %v884_v37 = vpop.permute.xlu1 %883 }
 0x514   :  { %v885_v31 = vrot.slane %v884_v37, 2  ;;  %v1507_v53 = vrot.slane %v2399_v34, 2 }
 0x516   :  { %v886_v43 = vsel %vm502_vm1, %v884_v37, %v885_v31  ;;  %v1508_v58 = vsel %vm447_vm12, %v2399_v34, %v1507_v53 }
 0x517   :  { %v2405_v47 = vadd.f32 %v886_v43, %v878_v40  ;;  %v1042_v42 = vpop.permute.xlu0 %1041  ;;  %v1200_v48 = vpop.permute.xlu1 %1199  ;;  %v1350_v40 = vsel %vm458_vm13, %v1348_v25, %v1349_v17  ;;  %v1194_v43 = vadd.f32 %v1192_v26, %v1184_v33 }
 0x518   :  { %v1043_v59 = vrot.slane %v1042_v42, 2  ;;  %v1201_v18 = vrot.slane %v1200_v48, 2  ;;  %v1352_v28 = vadd.f32 %v1350_v40, %v1342_v24 }
 0x519   :  { %v2411_v55 = vrot.slane %v2405_v47, %v2382_v5 }
 0x51a   :  { %v1044_v52 = vsel %vm491_vm0, %v1042_v42, %v1043_v59  ;;  %v1202_v44 = vsel %vm480_vm15, %v1200_v48, %v1201_v18  ;;  %v457_v48 = vrot.slane %v2169_v8, 2 }
 0x51b   :  { %v1358_v30 = vpop.permute.xlu0 %1357  ;;  %914 = vrot.lane.b32.xlu1 %v2411_v55, %s1895_s4  ;;  %v1516_v61 = vpop.permute.xlu1 %1515  ;;  %v1046_v15 = vadd.f32 %v1044_v52, %v1036_v7  ;;  %v1204_v20 = vadd.f32 %v1202_v44, %v1194_v43  ;;  %v1510_v7 = vadd.f32 %v1508_v58, %v2367_v27  ;;  %v470_v27 = vsel %vm469_vm14, %v2183_v13, %v468_v3 }
 0x51c   :  { %v1359_v29 = vrot.slane %v1358_v30, 2  ;;  %v1517_v54 = vrot.slane %v1516_v61, 2  ;;  %v459_v18 = vsel %vm458_vm13, %v2169_v8, %v457_v48  ;;  %v730_v13 = vcombine.high %v2386_v10, %v2386_v10 }
 0x51d   :  { %v461_v35 = vadd.f32 %v459_v18, %v450_v63  ;;  %v507_v58 = vstv %s2466_s0  ;;  %v1821_v63 = vld [vmem:[#allocation2 + $0x6] sm:$0x3f]  ;;  %v913_v3 = vcombine.high %v2411_v55, %v2411_v55 }
 0x51e   :  { %v1360_v51 = vsel %vm469_vm14, %v1358_v30, %v1359_v29  ;;  %v1518_v52 = vsel %vm458_vm13, %v1516_v61, %v1517_v54 }
 0x51f   :  { %v1052_v6 = vpop.permute.xlu0 %1051  ;;  %v1210_v11 = vpop.permute.xlu1 %1209  ;;  %v1362_v0 = vadd.f32 %v1360_v51, %v1352_v28  ;;  %v1520_v61 = vadd.f32 %v1518_v52, %v1510_v7  ;;  %v472_v44 = vadd.f32 %v470_v27, %v461_v35 }
 0x520   :  { %v1053_v21 = vrot.slane %v1052_v6, 2  ;;  %v1211_v9 = vrot.slane %v1210_v11, 2 }
 0x522   :  { %v1054_v32 = vsel %vm502_vm1, %v1052_v6, %v1053_v21  ;;  %v1212_v25 = vsel %vm491_vm0, %v1210_v11, %v1211_v9 }
 0x523   :  { %v2433_v37 = vadd.f32 %v1054_v32, %v1046_v15  ;;  %v1368_v38 = vpop.permute.xlu0 %1367  ;;  %v1526_v31 = vpop.permute.xlu1 %1525  ;;  %v1214_v1 = vadd.f32 %v1212_v25, %v1204_v20  ;;  %v744_v20 = vrot.slane %v730_v13, %v2382_v5 }
 0x524   :  { %v1369_v41 = vrot.slane %v1368_v38, 2  ;;  %v1527_v36 = vrot.slane %v1526_v31, 2 }
 0x525   :  { %v2440_v42 = vrot.slane %v2433_v37, %v2382_v5  ;;  %v1066_v52 = vcombine.high %v2433_v37, %v2433_v37 }
 0x526   :  { %v1370_v4 = vsel %vm480_vm15, %v1368_v38, %v1369_v41  ;;  %v1528_v21 = vsel %vm469_vm14, %v1526_v31, %v1527_v36  ;;  %v479_v38 = vrot.slane %v2185_v14, 2 }
 0x527   :  { %v1220_v59 = vpop.permute.xlu0 %1219  ;;  %1082 = vrot.lane.b32.xlu0 %v2440_v42, %s1907_s18  ;;  %v1378_v60 = vpop.permute.xlu1 %1377  ;;  %v1372_v6 = vadd.f32 %v1370_v4, %v1362_v0  ;;  %v1530_v32 = vadd.f32 %v1528_v21, %v1520_v61  ;;  %v508_v0 = vmul.f32 %v1821_v63, %v507_v58  ;;  %v1059_v63 = vsub.s32 3, %v2008_v50 }
 0x528   :  { %v1221_v30 = vrot.slane %v1220_v59, 2  ;;  %v1379_v39 = vrot.slane %v1378_v60, 2  ;;  %v481_v51 = vsel %vm480_vm15, %v2185_v14, %v479_v38 }
 0x529   :  { %v483_v48 = vadd.f32 %v481_v51, %v472_v44  ;;  %v1081_v44 = vcombine.high %v2440_v42, %v2440_v42 }
 0x52a   :  { %v1222_v34 = vsel %vm502_vm1, %v1220_v59, %v1221_v30  ;;  %v1380_v2 = vsel %vm491_vm0, %v1378_v60, %v1379_v39 }
 0x52b   :  { %v2457_v11 = vadd.f32 %v1222_v34, %v1214_v1  ;;  %v1536_v16 = vpop.permute.xlu0 %1535  ;;  %v1388_v17 = vpop.permute.xlu1 %1387  ;;  %v1382_v26 = vadd.f32 %v1380_v2, %v1372_v6  ;;  %v745_v6 = vcombine.high %v2392_v19, %v2392_v19 }
 0x52c   :  { %v1537_v12 = vrot.slane %v1536_v16, 2  ;;  %v1389_v23 = vrot.slane %v1388_v17, 2 }
 0x52d   :  { %v2464_v15 = vrot.slane %v2457_v11, %v2382_v5 }
 0x52e   :  { %v1538_v29 = vsel %vm480_vm15, %v1536_v16, %v1537_v12  ;;  %v1390_v8 = vsel %vm502_vm1, %v1388_v17, %v1389_v23  ;;  %v898_v16 = vcombine.high %v2405_v47, %v2405_v47  ;;  %v1080_v12 = vrot.slane %v1066_v52, %v2382_v5  ;;  %v435_v52 = vld [vmem:[%s2602_s5 + $0x8] sm:$0x7f] }
 0x52f   :  { %v2472_v9 = vadd.f32 %v1390_v8, %v1382_v26  ;;  %v1546_v33 = vpop.permute.xlu0 %1545  ;;  %1250 = vrot.lane.b32.xlu1 %v2464_v15, %s1908_s19  ;;  %v1556_v53 = vpop.permute.xlu1 %1555  ;;  %v1540_v41 = vadd.f32 %v1538_v29, %v1530_v32  ;;  %v1249_v32 = vcombine.high %v2464_v15, %v2464_v15 }
 0x530   :  { %v1547_v31 = vrot.slane %v1546_v33, 2  ;;  %v1557_v40 = vrot.slane %v1556_v53, 2  ;;  %v912_v19 = vrot.slane %v898_v16, %v2382_v5 }
 0x531   :  { %v2481_v62 = vrot.slane %v2472_v9, %v2382_v5 }
 0x532   :  { %v1548_v22 = vsel %vm491_vm0, %v1546_v33, %v1547_v31  ;;  %v1558_v54 = vsel %vm502_vm1, %v1556_v53, %v1557_v40  ;;  %v1402_v33 = vcombine.high %v2472_v9, %v2472_v9  ;;  %v1234_v40 = vcombine.high %v2457_v11, %v2457_v11 }
 0x533   :  { %v1550_v24 = vadd.f32 %v1548_v22, %v1540_v41  ;;  %v489_v43 = vpop.permute.xlu0 %488  ;;  %1418 = vrot.lane.b32.xlu0 %v2481_v62, %s1909_s20  ;;  %v500_v49 = vpop.permute.xlu1 %499 }
 0x534   :  { %v490_v10 = vrot.slane %v489_v43, 2  ;;  %v501_v25 = vrot.slane %v500_v49, 2  ;;  %v1416_v41 = vrot.slane %v1402_v33, %v2382_v5 }
 0x535   :  { %v1560_v28 = vadd.f32 %v1558_v54, %v1550_v24  ;;  %v1248_v24 = vrot.slane %v1234_v40, %v2382_v5 }
 0x536   :  { %v492_v59 = vsel %vm491_vm0, %v489_v43, %v490_v10  ;;  %v503_v14 = vsel %vm502_vm1, %v500_v49, %v501_v25  ;;  %v1417_v49 = vcombine.high %v2481_v62, %v2481_v62  ;;  %v2545_v62 = vsub.s32 0, %v2008_v50 }
 0x537   :  { %v1570_v60 = vcombine.high %v1560_v28, %v1560_v28  ;;  %v1577_v4 = vrot.slane %v1560_v28, %v2382_v5  ;;  %v494_v36 = vadd.f32 %v492_v59, %v483_v48  ;;  %v515_v30 = vpop.permute.xlu0 %514  ;;  %750 = vrot.lane.b32.xlu0 %v744_v20, %s1906_s24  ;;  %v525_v39 = vpop.permute.xlu1 %524  ;;  %v434_v59 = vld [vmem:[%s2602_s5] sm:$0x7f]  ;;  %s1911_s5 = smov [#allocation9]  }
 0x538   :  { %v516_v1 = vrot.slane %v515_v30, 2  ;;  %v526_v7 = vrot.slane %v525_v39, 2  ;;  %s1647_s23 = sshll.u32 %s1911_s5, 4  ;;  %s1648_s23 = int_to_ptr.vmem [resolvable:$true] %s1647_s23 }
 0x539   :  { %v1584_v34 = vrot.slane %v1570_v60, %v2382_v5  ;;  %v505_v2 = vadd.f32 %v503_v14, %v494_v36  ;;  %1586 = vrot.lane.b32.xlu1 %v1577_v4, %s1910_s2  ;;  %v1585_v11 = vcombine.high %v1577_v4, %v1577_v4  ;;  %v891_v36 = vsub.s32 2, %v2008_v50  ;;  %s1860_s3 = scalar_lea.vmem %s1648_s23, 512  ;;  %p1865_p0 = scmp.lt.s32.totalorder %s1648_s23, %s1648_s23 }
 0x53a   :  { %v517_v37 = vsel %vm447_vm12, %v515_v30, %v516_v1  ;;  %v527_v35 = vsel %vm458_vm13, %v525_v39, %v526_v7  ;;  %v573_v39 = vrot.slane %v434_v59, %v2545_v62  ;;  %p1861_p13 = scmp.ne.s32.totalorder %s1648_s23, %s1860_s3  ;;  %p1866_p1 = scmp.lt.s32.totalorder %s1860_s3, %s1860_s3 }
 0x53b   :  { %v509_v17 = vadd.f32 %v508_v0, %v505_v2  ;;  %v535_v18 = vpop.permute.xlu0 %534  ;;  %916 = vrot.lane.b32.xlu0 %v913_v3, %s1895_s4  ;;  %v545_v55 = vpop.permute.xlu1 %544  ;;  %v892_v3 = vrot.slane %v434_v59, %v891_v36 }
 0x53c   :  { %v536_v21 = vrot.slane %v535_v18, 2  ;;  %v546_v61 = vrot.slane %v545_v55, 2  ;;  %p1867_p2 = por %p1866_p1, %p1865_p0 }
 0x53d   :  { %v519_v23 = vadd.f32 %v517_v37, %v509_v17  ;;  %748 = vrot.lane.b32.xlu1 %v745_v6, %s1906_s24  ;;  %v1060_v6 = vrot.slane %v434_v59, %v1059_v63  ;;  %v577_v37 = vrot.slane %v435_v52, %v2545_v62 }
 0x53e   :  { %v537_v29 = vsel %vm469_vm14, %v535_v18, %v536_v21  ;;  %v547_v38 = vsel %vm480_vm15, %v545_v55, %v546_v61  ;;  %v1227_v18 = vsub.s32 4, %v2008_v50  ;;  %p1868_p3 = pnand %p1867_p2, %p1861_p13 }
 0x53f   :  { %v529_v26 = vadd.f32 %v527_v35, %v519_v23  ;;  %v555_v47 = vpop.permute.xlu0 %554  ;;  %1086 = vrot.lane.b32.xlu0 %v1080_v12, %s1907_s18  ;;  %v565_v27 = vpop.permute.xlu1 %564  ;;  %v896_v12 = vrot.slane %v435_v52, %v891_v36 }
 0x540   :  { %v556_v8 = vrot.slane %v555_v47, 2  ;;  %v566_v31 = vrot.slane %v565_v27, 2 }
 0x541   :  { %v539_v53 = vadd.f32 %v537_v29, %v529_v26  ;;  %918 = vrot.lane.b32.xlu1 %v912_v19, %s1895_s4  ;;  %v1395_v19 = vsub.s32 5, %v2008_v50 }
 0x542   :  { %v557_v15 = vsel %vm491_vm0, %v555_v47, %v556_v8  ;;  %v567_v22 = vsel %vm502_vm1, %v565_v27, %v566_v31  ;;  %v1064_v27 = vrot.slane %v435_v52, %v1059_v63 }
 0x543   :  { %v549_v13 = vadd.f32 %v547_v38, %v539_v53  ;;  %1252 = vrot.lane.b32.xlu0 %v1249_v32, %s1908_s19  ;;  %v1228_v32 = vrot.slane %v434_v59, %v1227_v18  ;;  %v1232_v53 = vrot.slane %v435_v52, %v1227_v18  ;;  %v1563_v38 = vsub.s32 6, %v2008_v50 }
 0x545   :  { %v559_v9 = vadd.f32 %v557_v15, %v549_v13  ;;  %1084 = vrot.lane.b32.xlu1 %v1081_v44, %s1907_s18 }
 0x547   :  { %v569_v43 = vadd.f32 %v567_v22, %v559_v9  ;;  %1422 = vrot.lane.b32.xlu0 %v1416_v41, %s1909_s20  ;;  %v1396_v9 = vrot.slane %v434_v59, %v1395_v19 }
 0x549   :  { %v585_v42 = vrot.slane %v569_v43, %v2382_v5  ;;  %1254 = vrot.lane.b32.xlu1 %v1248_v24, %s1908_s19  ;;  %v2542_v5 = vsub.s32 1, %v2008_v50  ;;  %v1564_v50 = vrot.slane %v434_v59, %v1563_v38 }
 0x54b   :  { %1588 = vrot.lane.b32.xlu0 %v1585_v11, %s1910_s2  ;;  %v724_v60 = vrot.slane %v434_v59, %v2542_v5  ;;  %v728_v2 = vrot.slane %v435_v52, %v2542_v5  ;;  %v586_v55 = vcombine.high %v585_v42, %v585_v42 }
 0x54d   :  { %1420 = vrot.lane.b32.xlu1 %v1417_v49, %s1909_s20  ;;  %v590_v31 = vmul.f32 %v586_v55, %v577_v37 }
 0x551   :  { %1590 = vrot.lane.b32.xlu1 %v1584_v34, %s1910_s2  ;;  %v589_v34 = vmul.f32 %v585_v42, %v573_v39  ;;  %v1400_v42 = vrot.slane %v435_v52, %v1395_v19 }
 0x581   :  { %v747_v51 = vpop.permute.xlu0 %746 }
 0x58d   :  { %v915_v10 = vpop.permute.xlu1 %914 }
 0x599   :  { %v1083_v54 = vpop.permute.xlu0 %1082 }
 0x5a1   :  { %v1251_v48 = vpop.permute.xlu1 %1250 }
 0x5a5   :  { %v2537_v25 = vpop.permute.xlu0 %1418 }
 0x5a9   :  { %v751_v28 = vpop.permute.xlu0 %750 }
 0x5ab   :  { %v2539_v58 = vpop.permute.xlu1 %1586 }
 0x5ad   :  { %v917_v20 = vpop.permute.xlu0 %916 }
 0x5ae   :  { %v921_v16 = vsel %vm920_vm3, %v915_v10, %v917_v20 }
 0x5af   :  { %v749_v4 = vpop.permute.xlu1 %748  ;;  %v925_v26 = vmul.f32 %v921_v16, %v892_v3 }
 0x5b0   :  { %v753_v30 = vsel %vm752_vm2, %v747_v51, %v749_v4  ;;  %v754_v17 = vsel %vm752_vm2, %v749_v4, %v751_v28 }
 0x5b1   :  { %v1087_v14 = vpop.permute.xlu0 %1086  ;;  %v757_v0 = vmul.f32 %v753_v30, %v724_v60  ;;  %v758_v47 = vmul.f32 %v754_v17, %v728_v2  ;;  %v1568_v60 = vrot.slane %v435_v52, %v1563_v38 }
 0x5b3   :  { %v919_v1 = vpop.permute.xlu1 %918  ;;  %v759_v21 = vadd.f32 %v757_v0, %v589_v34  ;;  %v760_v22 = vadd.f32 %v758_v47, %v590_v31 }
 0x5b4   :  { %v922_v35 = vsel %vm920_vm3, %v917_v20, %v919_v1 }
 0x5b5   :  { %v1253_v7 = vpop.permute.xlu0 %1252  ;;  %v926_v40 = vmul.f32 %v922_v35, %v896_v12  ;;  %v927_v44 = vadd.f32 %v925_v26, %v759_v21  ;;  %v1822_v26 = vld [vmem:[#allocation4] sm:$0xff] }
 0x5b6   :  { %v1257_v15 = vsel %vm1256_vm5, %v1251_v48, %v1253_v7 }
 0x5b7   :  { %v1085_v23 = vpop.permute.xlu1 %1084  ;;  %v928_v49 = vadd.f32 %v926_v40, %v760_v22  ;;  %v1261_v51 = vmul.f32 %v1257_v15, %v1228_v32  ;;  %v1824_v32 = vld [vmem:[#allocation4 + $0x8] sm:$0xff] }
 0x5b8   :  { %v1089_v61 = vsel %vm1088_vm4, %v1083_v54, %v1085_v23  ;;  %v1090_v33 = vsel %vm1088_vm4, %v1085_v23, %v1087_v14 }
 0x5b9   :  { %v1093_v29 = vmul.f32 %v1089_v61, %v1060_v6  ;;  %v1423_v8 = vpop.permute.xlu0 %1422  ;;  %v1094_v24 = vmul.f32 %v1090_v33, %v1064_v27 }
 0x5bb   :  { %v1255_v13 = vpop.permute.xlu1 %1254  ;;  %v1095_v43 = vadd.f32 %v1093_v29, %v927_v44  ;;  %v1096_v4 = vadd.f32 %v1094_v24, %v928_v49  ;;  %v1823_v29 = vld [vmem:[#allocation4 + $0x10] sm:$0xff] }
 0x5bc   :  { %v1258_v41 = vsel %vm1256_vm5, %v1253_v7, %v1255_v13 }
 0x5bd   :  { %v1589_v11 = vpop.permute.xlu0 %1588  ;;  %v1262_v54 = vmul.f32 %v1258_v41, %v1232_v53  ;;  %v1263_v36 = vadd.f32 %v1261_v51, %v1095_v43 }
 0x5be   :  { %v1593_v28 = vsel %vm1592_vm6, %v2539_v58, %v1589_v11 }
 0x5bf   :  { %v1421_v10 = vpop.permute.xlu1 %1420  ;;  %v1264_v14 = vadd.f32 %v1262_v54, %v1096_v4  ;;  %v1597_v63 = vmul.f32 %v1593_v28, %v1564_v50 }
 0x5c0   :  { %v1425_v20 = vsel %vm1424_vm7, %v2537_v25, %v1421_v10  ;;  %v1426_v48 = vsel %vm1424_vm7, %v1421_v10, %v1423_v8 }
 0x5c1   :  { %v1429_v30 = vmul.f32 %v1425_v20, %v1396_v9  ;;  %v1430_v39 = vmul.f32 %v1426_v48, %v1400_v42 }
 0x5c3   :  { %v1431_v0 = vadd.f32 %v1429_v30, %v1263_v36  ;;  %v1591_v1 = vpop.permute.xlu1 %1590  ;;  %v1432_v34 = vadd.f32 %v1430_v39, %v1264_v14 }
 0x5c4   :  { %v1594_v3 = vsel %vm1592_vm6, %v1589_v11, %v1591_v1 }
 0x5c5   :  { %v1599_v59 = vadd.f32 %v1597_v63, %v1431_v0  ;;  %v1598_v2 = vmul.f32 %v1594_v3, %v1568_v60 }
 0x5c7   :  { %v1762_v7 = vmul.f32 -1.442695, %v1599_v59  ;;  %v1600_v6 = vadd.f32 %v1598_v2, %v1432_v34 }
 0x5c9   :  { %1812 = vpow2.f32 %v1762_v7  ;;  %v1763_v58 = vmul.f32 -1.442695, %v1600_v6 }
 0x5cb   :  { %1814 = vpow2.f32 %v1763_v58 }
 0x5d3   :  { %v1813_v25 = vpop.eup %1812 }
 0x5d4   :  { %v1607_v52 = vadd.f32 1.0, %v1813_v25 }
 0x5d5   :  { %v1815_v16 = vpop.eup %1814 }
 0x5d6   :  { %1816 = vrcp.f32 %v1607_v52  ;;  %v1608_v17 = vadd.f32 1.0, %v1815_v16 }
 0x5d8   :  { %1818 = vrcp.f32 %v1608_v17 }
 0x5e0   :  { %v1817_v18 = vpop.eup %1816 }
 0x5e1   :  { %v1616_v55 = vrot.slane %v1817_v18, %v2545_v62  ;;  %v1630_v37 = vrot.slane %v1817_v18, %v2542_v5 }
 0x5e2   :  { %v1819_v21 = vpop.eup %1818 }
 0x5e3   :  { %v1620_v12 = vrot.slane %v1819_v21, %v2545_v62  ;;  %v1621_v23 = vmul.f32 %v1616_v55, %v2000_v45  ;;  %v1634_v35 = vrot.slane %v1819_v21, %v2542_v5  ;;  %v1635_v61 = vmul.f32 %v1630_v37, %v2015_v56  ;;  %v1825_v62 = vld [vmem:[#allocation4 + $0x18] sm:$0xff] }
 0x5e5   :  { %v1622_v19 = vmul.f32 %v1620_v12, %v2003_v46  ;;  %v1623_v47 = vadd.f32 %v1822_v26, %v1621_v23  ;;  %v1636_v27 = vmul.f32 %v1634_v35, %v2018_v57  ;;  %v1637_v8 = vadd.f32 %v1823_v29, %v1635_v61 }
 0x5e7   :  { %v1624_v33 = vadd.f32 %v1824_v32, %v1622_v19  ;;  %1625 = vst [vmem:[#allocation9] sm:$0xff] %v1623_v47  ;;  %v1638_v53 = vadd.f32 %v1825_v62, %v1636_v27  ;;  %1640 = vst [vmem:[#allocation9 + $0x10] sm:$0xff] %v1637_v8 }
 0x5e9   :  { %1626 = vst [vmem:[#allocation9 + $0x8] sm:$0xff] %v1624_v33  ;;  %1641 = vst [vmem:[#allocation9 + $0x18] sm:$0xff] %v1638_v53 }
 0x5ea   :  { %1871 = shalt.err (!%p1868_p3)
}
 0x5eb   :  { %s1872_s27 = scalar_lea.hbm %s2604_s7, 512 }
 0x5ec   :  { %p1873_p4 = scmp.ne.s32.totalorder %s2604_s7, %s1872_s27  ;;  %p1876_p5 = scmp.lt.u32.totalorder %s1872_s27, %s2604_s7 }
 0x5ee   :  { %p1878_p6 = pnand %p1876_p5, %p1873_p4 }
 0x5f0   :  { %1881 = shalt.err (!%p1878_p6)
}
 0x5f1   :  { %1653 = dma.vmem_to_hbm [thread:$0]  %s1648_s23, 512, %s2604_s7, [#allocation6], %s1889_s6, %s1889_s6, %s1890_s14  }
 0x5f2   :  { %1886 = dma.done.wait [#allocation6], 512  }
 0x5f3   :  { %1887 = vsyncadd [#allocation6], 4294966784 }
 0x5f4   :  { %1657 = vsyncpa [#allocation5], 1 }
 0x5f5   :  { %1658 = vsyncpa [#allocation6], 1 }
 0x5f6   :  { %1659 = vsyncpa [#allocation7], 1 }

</bundles_post_ra>
